<compile_context>
chip_gen: v6e
topology: v6e:2x2x1
jax: 0.10.0
libtpu: 0.0.40
codegen_flags: <defaults>
</compile_context>

<pallas_src>
import math
import functools

import jax
import jax.numpy as jnp
from jax import lax
from jax.experimental import pallas as pl
from jax.experimental.pallas import tpu as pltpu


# ----------------------------- Pallas kernel ---------------------------------

def mha_kernel(x_ref,        # (S, D)   bf16  full-sequence slab for this batch element
               wq_ref,       # (D, D)   bf16  query weight (pre-scaled by 1/sqrt(hd))
               bq_ref,       # (1, D)   f32   query bias   (pre-scaled)
               wkv_ref,      # (D, 2D)  bf16  fused key/value weight
               bkv_ref,      # (1, 2D)  f32   fused key/value bias
               wo_ref,       # (D, D)   bf16  output projection weight
               bo_ref,       # (1, D)   f32   output projection bias
               o_ref,        # (TQ, D)  f32
               k_scr,        # (H, S, hd) bf16  persistent per-batch K cache
               v_scr,        # (H, S, hd) bf16  persistent per-batch V cache
               *, n_heads: int, q_tile: int):
    S, D = x_ref.shape
    H = n_heads
    hd = D // H
    TQ = q_tile

    qi = pl.program_id(1)
    q_start = pl.multiple_of(qi * TQ, TQ)

    # ---- once per batch element: fused K/V projection over the full sequence ----
    @pl.when(qi == 0)
    def _():
        x_all = x_ref[...]                                                # (S, D) bf16
        kv = jnp.dot(x_all, wkv_ref[...],
                     preferred_element_type=jnp.float32) + bkv_ref[...]   # (S, 2D) f32
        kv = kv.astype(jnp.bfloat16)
        for h in range(H):               # static head split, once per batch element
            k_scr[h, :, :] = kv[:, h * hd:(h + 1) * hd]
            v_scr[h, :, :] = kv[:, D + h * hd:D + (h + 1) * hd]

    # ---- per q-tile: Q projection (softmax scale folded into wq/bq) ----
    x_q = x_ref[pl.ds(q_start, TQ), :]                                    # (TQ, D) bf16
    q = jnp.dot(x_q, wq_ref[...],
                preferred_element_type=jnp.float32) + bq_ref[...]         # (TQ, D) f32
    q = q.astype(jnp.bfloat16)
    qh = jnp.stack([q[:, h * hd:(h + 1) * hd] for h in range(H)], axis=0)  # (H, TQ, hd)

    k = k_scr[...]                                                        # (H, S, hd) bf16
    v = v_scr[...]

    # Scores (scale already folded into the Q projection).
    s = jnp.einsum('hqe,hse->hqs', qh, k,
                   preferred_element_type=jnp.float32)                    # (H, TQ, S) f32

    # Causal mask relative to this q-tile's offset (diagonal kept -> no NaN rows).
    row = lax.broadcasted_iota(jnp.int32, (TQ, S), 0) + q_start
    col = lax.broadcasted_iota(jnp.int32, (TQ, S), 1)
    s = jnp.where((row >= col)[None], s, -1e30)

    # Softmax (EUP exp + approximate reciprocal for the normalizer; eval-only kernel).
    m = jnp.max(s, axis=-1, keepdims=True)
    p = jnp.exp(s - m)
    p = p * pl.reciprocal(jnp.sum(p, axis=-1, keepdims=True), approx=True)

    # Attention-weighted values.
    ctx = jnp.einsum('hqs,hse->hqe', p.astype(jnp.bfloat16), v,
                     preferred_element_type=jnp.float32)                  # (H, TQ, hd) f32

    # Fused output projection: head-major flatten -> one full-width (TQ,D)@(D,D) matmul.
    ctx2 = jnp.concatenate([ctx[h].astype(jnp.bfloat16) for h in range(H)],
                           axis=-1)                                       # (TQ, D) bf16
    o_ref[...] = jnp.dot(ctx2, wo_ref[...],
                         preferred_element_type=jnp.float32) + bo_ref[...]


# ------------------------------ wrapper ---------------------------------------

def multi_head_attention(x, w_qkv, b_qkv, w_out, b_out, *, n_heads, q_tile=None):
    """Causal multi-head self-attention matching PyTorch MultiHeadAttention.forward
    (flash=True semantics, dropout treated as identity / eval mode)."""
    B, S, D = x.shape
    assert D % n_heads == 0
    H = n_heads
    hd = D // H
    TQ = q_tile if q_tile is not None else min(S, 128)
    assert S % TQ == 0, "demo wrapper assumes S divisible by the q-tile size"
    n_q = S // TQ
    scale = 1.0 / math.sqrt(hd)

    # nn.Linear weights are (out, in); pre-transpose to (in, out) and fuse so the MXU
    # sees lane-dense N (wq: D, wkv: 2D, wo: D). Scale folded into wq / bq.
    wq = (w_qkv[:D].T * scale).astype(jnp.bfloat16)            # (D, D)
    wkv = w_qkv[D:].T.astype(jnp.bfloat16)                     # (D, 2D)  [K cols | V cols]
    bq = (b_qkv[:D] * scale).reshape(1, D).astype(jnp.float32)
    bkv = b_qkv[D:].reshape(1, 2 * D).astype(jnp.float32)
    wo = w_out.T.astype(jnp.bfloat16)                          # (D, D)
    bo = b_out.reshape(1, D).astype(jnp.float32)

    # bf16 activations at the HBM->VMEM boundary (MXU consumes bf16 anyway).
    x_bf16 = x.astype(jnp.bfloat16)

    weights = (wq, bq, wkv, bkv, wo, bo)

    # VMEM working-set estimate, capped at 48 MiB so the config stays inside v7x's 64 MiB.
    est = (2 * S * D * 2                                        # double-buffered bf16 x slab
           + sum(int(a.size) * a.dtype.itemsize for a in weights)
           + 2 * H * S * hd * 2                                 # K/V scratch (bf16)
           + 2 * TQ * D * 4                                     # double-buffered f32 out block
           + 3 * H * TQ * S * 4 + 4 * TQ * D * 4)               # scores/probs + intermediates
    vmem_limit = int(min(48 * 2 ** 20, max(16 * 2 ** 20, 2 * est)))

    # Advisory cost estimate matching what the kernel actually executes.
    flops = (2 * B * S * D * (2 * D)      # K/V projection (once per batch element)
             + 2 * B * S * D * D          # Q projection (summed over q tiles)
             + 4 * B * H * S * S * hd     # scores + context
             + 2 * B * S * D * D)         # output projection
    transcendentals = B * H * S * S
    bytes_accessed = (B * S * D * 2 + B * S * D * 4
                      + sum(int(a.size) * a.dtype.itemsize for a in weights))

    kernel = functools.partial(mha_kernel, n_heads=H, q_tile=TQ)

    def build(single_buffer_weights: bool):
        def const_spec(a):
            nd = a.ndim
            kwargs = {}
            if single_buffer_weights:
                # Constant blocks: fetched once, never re-indexed -> single-buffered.
                kwargs = dict(pipeline_mode=pl.Buffered(1))
            return pl.BlockSpec(a.shape, lambda b, qi, nd=nd: (0,) * nd, **kwargs)

        in_specs = [pl.BlockSpec((pl.Squeezed(), S, D), lambda b, qi: (b, 0, 0))]
        in_specs += [const_spec(a) for a in weights]
        out_specs = pl.BlockSpec((pl.Squeezed(), TQ, D), lambda b, qi: (b, qi, 0))

        return pl.pallas_call(
            kernel,
            out_shape=jax.ShapeDtypeStruct((B, S, D), jnp.float32),
            grid_spec=pltpu.PrefetchScalarGridSpec(
                num_scalar_prefetch=0,
                grid=(B, n_q),
                in_specs=in_specs,
                out_specs=out_specs,
                scratch_shapes=[pltpu.VMEM((H, S, hd), jnp.bfloat16),
                                pltpu.VMEM((H, S, hd), jnp.bfloat16)],
            ),
            compiler_params=pltpu.CompilerParams(
                # B megacore-parallel; q axis must stay sequential ("arbitrary") so the
                # K/V scratch written at q-tile 0 persists across the remaining tiles.
                dimension_semantics=("parallel", "arbitrary"),
                vmem_limit_bytes=vmem_limit,
            ),
            cost_estimate=pl.CostEstimate(
                flops=int(flops),
                transcendentals=int(transcendentals),
                bytes_accessed=int(bytes_accessed),
            ),
        )

    try:
        return build(True)(x_bf16, *weights)
    except Exception:
        # TODO(synk): per-operand single-buffering unsupported on this JAX build;
        #             fall back to default double-buffered constant weights.
        return build(False)(x_bf16, *weights)


# --------------------------- pure-JAX reference --------------------------------

def mha_ref(x, w_qkv, b_qkv, w_out, b_out, *, n_heads):
    B, S, D = x.shape
    hd = D // n_heads
    qkv = x @ w_qkv.T + b_qkv
    q, k, v = jnp.split(qkv, 3, axis=-1)
    q = q.reshape(B, S, n_heads, hd).transpose(0, 2, 1, 3)
    k = k.reshape(B, S, n_heads, hd).transpose(0, 2, 1, 3)
    v = v.reshape(B, S, n_heads, hd).transpose(0, 2, 1, 3)
    att = (q @ jnp.swapaxes(k, -2, -1)) / math.sqrt(hd)
    mask = jnp.tril(jnp.ones((S, S), dtype=bool))
    att = jnp.where(mask[None, None], att, -jnp.inf)
    att = jax.nn.softmax(att, axis=-1)
    out = (att @ v).transpose(0, 2, 1, 3).reshape(B, S, D)
    return out @ w_out.T + b_out


# ---------------------------------- main ---------------------------------------

if __name__ == "__main__":
    B, S, D, H = 2, 8, 32, 4

    key = jax.random.PRNGKey(0)
    k1, k2, k3, k4, k5 = jax.random.split(key, 5)

    x = jax.random.normal(k1, (B, S, D), jnp.float32)
    w_qkv = 0.05 * jax.random.normal(k2, (3 * D, D), jnp.float32)
    b_qkv = 0.02 * jax.random.normal(k3, (3 * D,), jnp.float32)
    w_out = 0.05 * jax.random.normal(k4, (D, D), jnp.float32)
    b_out = 0.02 * jax.random.normal(k5, (D,), jnp.float32)

    y = multi_head_attention(x, w_qkv, b_qkv, w_out, b_out, n_heads=H)
    y = jax.block_until_ready(y)

    y_ref = mha_ref(x, w_qkv, b_qkv, w_out, b_out, n_heads=H)
    assert y.shape == (B, S, D)
    max_err = float(jnp.max(jnp.abs(y - y_ref)))
    # bf16 MXU inputs with f32 accumulation -> relaxed tolerance vs the f32 reference.
    assert jnp.allclose(y, y_ref, atol=2e-2, rtol=2e-2), \
        f"mismatch vs reference (max abs err {max_err})"

    print("KERNEL_OK")
</pallas_src>

<mosaic_0001>
module attributes {stable_mosaic.version = 11 : i64} {
  func.func @mha_kernel(%arg0: i32, %arg1: i32, %arg2: memref<1x8x32xbf16, #tpu.memory_space<vmem>>, %arg3: memref<32x32xbf16, #tpu.memory_space<vmem>>, %arg4: memref<1x32xf32, #tpu.memory_space<vmem>>, %arg5: memref<32x64xbf16, #tpu.memory_space<vmem>>, %arg6: memref<1x64xf32, #tpu.memory_space<vmem>>, %arg7: memref<32x32xbf16, #tpu.memory_space<vmem>>, %arg8: memref<1x32xf32, #tpu.memory_space<vmem>>, %arg9: memref<1x8x32xf32, #tpu.memory_space<vmem>>, %arg10: memref<4x8x8xbf16, #tpu.memory_space<vmem>>, %arg11: memref<4x8x8xbf16, #tpu.memory_space<vmem>>) attributes {dimension_semantics = [#tpu.dimension_semantics<parallel>, #tpu.dimension_semantics<arbitrary>], iteration_bounds = array<i64: 2, 1>, scalar_prefetch = 0 : i64, scratch_operands = 2 : i64, tpu.core_type = #tpu.core_type<tc>, window_params = [{transform_indices = @transform_0, window_bounds = array<i64: 1, 8, 32>}, {pipeline_mode = #tpu.pipeline_mode<synchronous>, transform_indices = @transform_1, window_bounds = array<i64: 32, 32>}, {pipeline_mode = #tpu.pipeline_mode<synchronous>, transform_indices = @transform_2, window_bounds = array<i64: 1, 32>}, {pipeline_mode = #tpu.pipeline_mode<synchronous>, transform_indices = @transform_3, window_bounds = array<i64: 32, 64>}, {pipeline_mode = #tpu.pipeline_mode<synchronous>, transform_indices = @transform_4, window_bounds = array<i64: 1, 64>}, {pipeline_mode = #tpu.pipeline_mode<synchronous>, transform_indices = @transform_5, window_bounds = array<i64: 32, 32>}, {pipeline_mode = #tpu.pipeline_mode<synchronous>, transform_indices = @transform_6, window_bounds = array<i64: 1, 32>}, {transform_indices = @transform_7, window_bounds = array<i64: 1, 8, 32>}]} {
    %c8_i32 = arith.constant 8 : i32
    %0 = arith.muli %arg1, %c8_i32 : i32
    %1 = tpu.assume_multiple %0, 8 : i32
    %c0_i32 = arith.constant 0 : i32
    %2 = arith.cmpi eq, %arg1, %c0_i32 : i32
    %3 = arith.extui %2 : i1 to i32
    %c0_i32_0 = arith.constant 0 : i32
    %4 = arith.cmpi ne, %3, %c0_i32_0 : i32
    scf.if %4 {
      %c0_25 = arith.constant 0 : index
      %c0_26 = arith.constant 0 : index
      %c0_27 = arith.constant 0 : index
      %69 = vector.load %arg2[%c0_25, %c0_26, %c0_27] : memref<1x8x32xbf16, #tpu.memory_space<vmem>>, vector<1x8x32xbf16>
      %70 = vector.shape_cast %69 : vector<1x8x32xbf16> to vector<8x32xbf16>
      %c0_28 = arith.constant 0 : index
      %c0_29 = arith.constant 0 : index
      %71 = vector.load %arg5[%c0_28, %c0_29] : memref<32x64xbf16, #tpu.memory_space<vmem>>, vector<32x64xbf16>
      %cst_30 = arith.constant dense<0.000000e+00> : vector<8x64xf32>
      %72 = tpu.matmul %70, %71, %cst_30 {dimension_numbers = #tpu.dot_dimension_numbers<[1], [0], [0], [1], [0, 0, 1, 1], [], []>} : vector<8x32xbf16>, vector<32x64xbf16>, vector<8x64xf32> -> vector<8x64xf32>
      %c0_31 = arith.constant 0 : index
      %c0_32 = arith.constant 0 : index
      %73 = vector.load %arg6[%c0_31, %c0_32] : memref<1x64xf32, #tpu.memory_space<vmem>>, vector<1x64xf32>
      %74 = vector.broadcast %73 : vector<1x64xf32> to vector<8x64xf32>
      %75 = arith.addf %72, %74 : vector<8x64xf32>
      %76 = arith.truncf %75 : vector<8x64xf32> to vector<8x64xbf16>
      %77 = vector.extract_strided_slice %76 {offsets = [0, 0], sizes = [8, 8], strides = [1, 1]} : vector<8x64xbf16> to vector<8x8xbf16>
      %c0_33 = arith.constant 0 : index
      %c0_34 = arith.constant 0 : index
      %c0_35 = arith.constant 0 : index
      %78 = vector.load %arg10[%c0_33, %c0_34, %c0_35] : memref<4x8x8xbf16, #tpu.memory_space<vmem>>, vector<1x8x8xbf16>
      %79 = vector.shape_cast %78 : vector<1x8x8xbf16> to vector<8x8xbf16>
      %80 = vector.shape_cast %77 : vector<8x8xbf16> to vector<1x8x8xbf16>
      tpu.vector_store %arg10[%c0_33, %c0_34, %c0_35], %80 {strides = array<i32>} : memref<4x8x8xbf16, #tpu.memory_space<vmem>>, vector<1x8x8xbf16>,
      %81 = vector.extract_strided_slice %76 {offsets = [0, 32], sizes = [8, 8], strides = [1, 1]} : vector<8x64xbf16> to vector<8x8xbf16>
      %c0_36 = arith.constant 0 : index
      %c0_37 = arith.constant 0 : index
      %c0_38 = arith.constant 0 : index
      %82 = vector.load %arg11[%c0_36, %c0_37, %c0_38] : memref<4x8x8xbf16, #tpu.memory_space<vmem>>, vector<1x8x8xbf16>
      %83 = vector.shape_cast %82 : vector<1x8x8xbf16> to vector<8x8xbf16>
      %84 = vector.shape_cast %81 : vector<8x8xbf16> to vector<1x8x8xbf16>
      tpu.vector_store %arg11[%c0_36, %c0_37, %c0_38], %84 {strides = array<i32>} : memref<4x8x8xbf16, #tpu.memory_space<vmem>>, vector<1x8x8xbf16>,
      %85 = vector.extract_strided_slice %76 {offsets = [0, 8], sizes = [8, 8], strides = [1, 1]} : vector<8x64xbf16> to vector<8x8xbf16>
      %c1 = arith.constant 1 : index
      %c0_39 = arith.constant 0 : index
      %c0_40 = arith.constant 0 : index
      %86 = vector.load %arg10[%c1, %c0_39, %c0_40] : memref<4x8x8xbf16, #tpu.memory_space<vmem>>, vector<1x8x8xbf16>
      %87 = vector.shape_cast %86 : vector<1x8x8xbf16> to vector<8x8xbf16>
      %88 = vector.shape_cast %85 : vector<8x8xbf16> to vector<1x8x8xbf16>
      tpu.vector_store %arg10[%c1, %c0_39, %c0_40], %88 {strides = array<i32>} : memref<4x8x8xbf16, #tpu.memory_space<vmem>>, vector<1x8x8xbf16>,
      %89 = vector.extract_strided_slice %76 {offsets = [0, 40], sizes = [8, 8], strides = [1, 1]} : vector<8x64xbf16> to vector<8x8xbf16>
      %c1_41 = arith.constant 1 : index
      %c0_42 = arith.constant 0 : index
      %c0_43 = arith.constant 0 : index
      %90 = vector.load %arg11[%c1_41, %c0_42, %c0_43] : memref<4x8x8xbf16, #tpu.memory_space<vmem>>, vector<1x8x8xbf16>
      %91 = vector.shape_cast %90 : vector<1x8x8xbf16> to vector<8x8xbf16>
      %92 = vector.shape_cast %89 : vector<8x8xbf16> to vector<1x8x8xbf16>
      tpu.vector_store %arg11[%c1_41, %c0_42, %c0_43], %92 {strides = array<i32>} : memref<4x8x8xbf16, #tpu.memory_space<vmem>>, vector<1x8x8xbf16>,
      %93 = vector.extract_strided_slice %76 {offsets = [0, 16], sizes = [8, 8], strides = [1, 1]} : vector<8x64xbf16> to vector<8x8xbf16>
      %c2 = arith.constant 2 : index
      %c0_44 = arith.constant 0 : index
      %c0_45 = arith.constant 0 : index
      %94 = vector.load %arg10[%c2, %c0_44, %c0_45] : memref<4x8x8xbf16, #tpu.memory_space<vmem>>, vector<1x8x8xbf16>
      %95 = vector.shape_cast %94 : vector<1x8x8xbf16> to vector<8x8xbf16>
      %96 = vector.shape_cast %93 : vector<8x8xbf16> to vector<1x8x8xbf16>
      tpu.vector_store %arg10[%c2, %c0_44, %c0_45], %96 {strides = array<i32>} : memref<4x8x8xbf16, #tpu.memory_space<vmem>>, vector<1x8x8xbf16>,
      %97 = vector.extract_strided_slice %76 {offsets = [0, 48], sizes = [8, 8], strides = [1, 1]} : vector<8x64xbf16> to vector<8x8xbf16>
      %c2_46 = arith.constant 2 : index
      %c0_47 = arith.constant 0 : index
      %c0_48 = arith.constant 0 : index
      %98 = vector.load %arg11[%c2_46, %c0_47, %c0_48] : memref<4x8x8xbf16, #tpu.memory_space<vmem>>, vector<1x8x8xbf16>
      %99 = vector.shape_cast %98 : vector<1x8x8xbf16> to vector<8x8xbf16>
      %100 = vector.shape_cast %97 : vector<8x8xbf16> to vector<1x8x8xbf16>
      tpu.vector_store %arg11[%c2_46, %c0_47, %c0_48], %100 {strides = array<i32>} : memref<4x8x8xbf16, #tpu.memory_space<vmem>>, vector<1x8x8xbf16>,
      %101 = vector.extract_strided_slice %76 {offsets = [0, 24], sizes = [8, 8], strides = [1, 1]} : vector<8x64xbf16> to vector<8x8xbf16>
      %c3 = arith.constant 3 : index
      %c0_49 = arith.constant 0 : index
      %c0_50 = arith.constant 0 : index
      %102 = vector.load %arg10[%c3, %c0_49, %c0_50] : memref<4x8x8xbf16, #tpu.memory_space<vmem>>, vector<1x8x8xbf16>
      %103 = vector.shape_cast %102 : vector<1x8x8xbf16> to vector<8x8xbf16>
      %104 = vector.shape_cast %101 : vector<8x8xbf16> to vector<1x8x8xbf16>
      tpu.vector_store %arg10[%c3, %c0_49, %c0_50], %104 {strides = array<i32>} : memref<4x8x8xbf16, #tpu.memory_space<vmem>>, vector<1x8x8xbf16>,
      %105 = vector.extract_strided_slice %76 {offsets = [0, 56], sizes = [8, 8], strides = [1, 1]} : vector<8x64xbf16> to vector<8x8xbf16>
      %c3_51 = arith.constant 3 : index
      %c0_52 = arith.constant 0 : index
      %c0_53 = arith.constant 0 : index
      %106 = vector.load %arg11[%c3_51, %c0_52, %c0_53] : memref<4x8x8xbf16, #tpu.memory_space<vmem>>, vector<1x8x8xbf16>
      %107 = vector.shape_cast %106 : vector<1x8x8xbf16> to vector<8x8xbf16>
      %108 = vector.shape_cast %105 : vector<8x8xbf16> to vector<1x8x8xbf16>
      tpu.vector_store %arg11[%c3_51, %c0_52, %c0_53], %108 {strides = array<i32>} : memref<4x8x8xbf16, #tpu.memory_space<vmem>>, vector<1x8x8xbf16>,
    } else {
    }
    %c0 = arith.constant 0 : index
    %5 = arith.index_cast %1 : i32 to index
    %c0_1 = arith.constant 0 : index
    %6 = vector.load %arg2[%c0, %5, %c0_1] : memref<1x8x32xbf16, #tpu.memory_space<vmem>>, vector<1x8x32xbf16>
    %7 = vector.shape_cast %6 : vector<1x8x32xbf16> to vector<8x32xbf16>
    %c0_2 = arith.constant 0 : index
    %c0_3 = arith.constant 0 : index
    %8 = vector.load %arg3[%c0_2, %c0_3] : memref<32x32xbf16, #tpu.memory_space<vmem>>, vector<32x32xbf16>
    %cst = arith.constant dense<0.000000e+00> : vector<8x32xf32>
    %9 = tpu.matmul %7, %8, %cst {dimension_numbers = #tpu.dot_dimension_numbers<[1], [0], [0], [1], [0, 0, 1, 1], [], []>} : vector<8x32xbf16>, vector<32x32xbf16>, vector<8x32xf32> -> vector<8x32xf32>
    %c0_4 = arith.constant 0 : index
    %c0_5 = arith.constant 0 : index
    %10 = vector.load %arg4[%c0_4, %c0_5] : memref<1x32xf32, #tpu.memory_space<vmem>>, vector<1x32xf32>
    %11 = vector.broadcast %10 : vector<1x32xf32> to vector<8x32xf32>
    %12 = arith.addf %9, %11 : vector<8x32xf32>
    %13 = arith.truncf %12 : vector<8x32xf32> to vector<8x32xbf16>
    %14 = vector.extract_strided_slice %13 {offsets = [0, 0], sizes = [8, 8], strides = [1, 1]} : vector<8x32xbf16> to vector<8x8xbf16>
    %15 = vector.extract_strided_slice %13 {offsets = [0, 8], sizes = [8, 8], strides = [1, 1]} : vector<8x32xbf16> to vector<8x8xbf16>
    %16 = vector.extract_strided_slice %13 {offsets = [0, 16], sizes = [8, 8], strides = [1, 1]} : vector<8x32xbf16> to vector<8x8xbf16>
    %17 = vector.extract_strided_slice %13 {offsets = [0, 24], sizes = [8, 8], strides = [1, 1]} : vector<8x32xbf16> to vector<8x8xbf16>
    %18 = vector.shape_cast %14 : vector<8x8xbf16> to vector<1x8x8xbf16>
    %19 = vector.shape_cast %15 : vector<8x8xbf16> to vector<1x8x8xbf16>
    %20 = vector.shape_cast %16 : vector<8x8xbf16> to vector<1x8x8xbf16>
    %21 = vector.shape_cast %17 : vector<8x8xbf16> to vector<1x8x8xbf16>
    %22 = tpu.concatenate %18, %19, %20, %21 in 0 : vector<1x8x8xbf16>, vector<1x8x8xbf16>, vector<1x8x8xbf16>, vector<1x8x8xbf16> -> vector<4x8x8xbf16>
    %c0_6 = arith.constant 0 : index
    %c0_7 = arith.constant 0 : index
    %c0_8 = arith.constant 0 : index
    %23 = vector.load %arg10[%c0_6, %c0_7, %c0_8] : memref<4x8x8xbf16, #tpu.memory_space<vmem>>, vector<4x8x8xbf16>
    %c0_9 = arith.constant 0 : index
    %c0_10 = arith.constant 0 : index
    %c0_11 = arith.constant 0 : index
    %24 = vector.load %arg11[%c0_9, %c0_10, %c0_11] : memref<4x8x8xbf16, #tpu.memory_space<vmem>>, vector<4x8x8xbf16>
    "tpu.trace_start"() <{level = 10 : i32, message = "hqe,hse->hqs"}> : () -> ()
    %cst_12 = arith.constant dense<0.000000e+00> : vector<4x8x8xf32>
    %25 = tpu.matmul %22, %23, %cst_12 {dimension_numbers = #tpu.dot_dimension_numbers<[2], [2], [1], [1], [0, 0, 0, 1, 1, 1], [0], [0]>} : vector<4x8x8xbf16>, vector<4x8x8xbf16>, vector<4x8x8xf32> -> vector<4x8x8xf32>
    "tpu.trace_stop"() : () -> ()
    %26 = tpu.iota {dimensions = array<i32: 0>} : vector<8x8xi32>
    %27 = vector.broadcast %1 : i32 to vector<8x8xi32>
    %28 = arith.addi %26, %27 : vector<8x8xi32>
    %29 = tpu.iota {dimensions = array<i32: 1>} : vector<8x8xi32>
    %30 = arith.cmpi sge, %28, %29 : vector<8x8xi32>
    %31 = vector.shape_cast %30 : vector<8x8xi1> to vector<1x8x8xi1>
    %cst_13 = arith.constant -1.000000e+30 : f32
    %32 = vector.shape_cast %31 : vector<1x8x8xi1> to vector<1x8x8xi1>
    %33 = vector.broadcast %32 : vector<1x8x8xi1> to vector<4x8x8xi1>
    %34 = vector.broadcast %cst_13 : f32 to vector<4x8x8xf32>
    %35 = arith.select %33, %25, %34 : vector<4x8x8xi1>, vector<4x8x8xf32>
    %cst_14 = arith.constant dense<0xFF800000> : vector<4x8xf32>
    %36 = vector.multi_reduction <maximumf>, %35, %cst_14 [2] : vector<4x8x8xf32> to vector<4x8xf32>
    %37 = vector.shape_cast %36 : vector<4x8xf32> to vector<4x8x1xf32>
    %38 = vector.broadcast %37 : vector<4x8x1xf32> to vector<4x8x8xf32>
    %39 = arith.subf %35, %38 : vector<4x8x8xf32>
    %40 = math.exp %39 : vector<4x8x8xf32>
    %cst_15 = arith.constant dense<0.000000e+00> : vector<4x8xf32>
    %41 = vector.multi_reduction <add>, %40, %cst_15 [2] : vector<4x8x8xf32> to vector<4x8xf32>
    %42 = vector.shape_cast %41 : vector<4x8xf32> to vector<4x8x1xf32>
    %43 = tpu.reciprocal %42 {approx = true} : vector<4x8x1xf32> -> vector<4x8x1xf32>
    %44 = vector.broadcast %43 : vector<4x8x1xf32> to vector<4x8x8xf32>
    %45 = arith.mulf %40, %44 : vector<4x8x8xf32>
    %46 = arith.truncf %45 : vector<4x8x8xf32> to vector<4x8x8xbf16>
    "tpu.trace_start"() <{level = 10 : i32, message = "hqs,hse->hqe"}> : () -> ()
    %cst_16 = arith.constant dense<0.000000e+00> : vector<4x8x8xf32>
    %47 = tpu.matmul %46, %24, %cst_16 {dimension_numbers = #tpu.dot_dimension_numbers<[2], [1], [1], [2], [0, 0, 0, 1, 1, 2], [0], [0]>} : vector<4x8x8xbf16>, vector<4x8x8xbf16>, vector<4x8x8xf32> -> vector<4x8x8xf32>
    "tpu.trace_stop"() : () -> ()
    %48 = vector.extract_strided_slice %47 {offsets = [0, 0, 0], sizes = [1, 8, 8], strides = [1, 1, 1]} : vector<4x8x8xf32> to vector<1x8x8xf32>
    %49 = vector.shape_cast %48 : vector<1x8x8xf32> to vector<8x8xf32>
    %50 = arith.truncf %49 : vector<8x8xf32> to vector<8x8xbf16>
    %51 = vector.extract_strided_slice %47 {offsets = [1, 0, 0], sizes = [1, 8, 8], strides = [1, 1, 1]} : vector<4x8x8xf32> to vector<1x8x8xf32>
    %52 = vector.shape_cast %51 : vector<1x8x8xf32> to vector<8x8xf32>
    %53 = arith.truncf %52 : vector<8x8xf32> to vector<8x8xbf16>
    %54 = vector.extract_strided_slice %47 {offsets = [2, 0, 0], sizes = [1, 8, 8], strides = [1, 1, 1]} : vector<4x8x8xf32> to vector<1x8x8xf32>
    %55 = vector.shape_cast %54 : vector<1x8x8xf32> to vector<8x8xf32>
    %56 = arith.truncf %55 : vector<8x8xf32> to vector<8x8xbf16>
    %57 = vector.extract_strided_slice %47 {offsets = [3, 0, 0], sizes = [1, 8, 8], strides = [1, 1, 1]} : vector<4x8x8xf32> to vector<1x8x8xf32>
    %58 = vector.shape_cast %57 : vector<1x8x8xf32> to vector<8x8xf32>
    %59 = arith.truncf %58 : vector<8x8xf32> to vector<8x8xbf16>
    %60 = tpu.concatenate %50, %53, %56, %59 in 1 : vector<8x8xbf16>, vector<8x8xbf16>, vector<8x8xbf16>, vector<8x8xbf16> -> vector<8x32xbf16>
    %c0_17 = arith.constant 0 : index
    %c0_18 = arith.constant 0 : index
    %61 = vector.load %arg7[%c0_17, %c0_18] : memref<32x32xbf16, #tpu.memory_space<vmem>>, vector<32x32xbf16>
    %cst_19 = arith.constant dense<0.000000e+00> : vector<8x32xf32>
    %62 = tpu.matmul %60, %61, %cst_19 {dimension_numbers = #tpu.dot_dimension_numbers<[1], [0], [0], [1], [0, 0, 1, 1], [], []>} : vector<8x32xbf16>, vector<32x32xbf16>, vector<8x32xf32> -> vector<8x32xf32>
    %c0_20 = arith.constant 0 : index
    %c0_21 = arith.constant 0 : index
    %63 = vector.load %arg8[%c0_20, %c0_21] : memref<1x32xf32, #tpu.memory_space<vmem>>, vector<1x32xf32>
    %64 = vector.broadcast %63 : vector<1x32xf32> to vector<8x32xf32>
    %65 = arith.addf %62, %64 : vector<8x32xf32>
    %c0_22 = arith.constant 0 : index
    %c0_23 = arith.constant 0 : index
    %c0_24 = arith.constant 0 : index
    %66 = vector.load %arg9[%c0_22, %c0_23, %c0_24] : memref<1x8x32xf32, #tpu.memory_space<vmem>>, vector<1x8x32xf32>
    %67 = vector.shape_cast %66 : vector<1x8x32xf32> to vector<8x32xf32>
    %68 = vector.shape_cast %65 : vector<8x32xf32> to vector<1x8x32xf32>
    tpu.vector_store %arg9[%c0_22, %c0_23, %c0_24], %68 {strides = array<i32>} : memref<1x8x32xf32, #tpu.memory_space<vmem>>, vector<1x8x32xf32>,
    return
  }
  func.func @transform_0(%arg0: i32, %arg1: i32) -> (i32, i32, i32) {
    %c0_i32 = arith.constant 0 : i32
    %c0_i32_0 = arith.constant 0 : i32
    %c0_i32_1 = arith.constant 0 : i32
    return %arg0, %c0_i32, %c0_i32_0 : i32, i32, i32
  }
  func.func @transform_1(%arg0: i32, %arg1: i32) -> (i32, i32) {
    %c0_i32 = arith.constant 0 : i32
    %c0_i32_0 = arith.constant 0 : i32
    %c0_i32_1 = arith.constant 0 : i32
    return %c0_i32, %c0_i32_0 : i32, i32
  }
  func.func @transform_2(%arg0: i32, %arg1: i32) -> (i32, i32) {
    %c0_i32 = arith.constant 0 : i32
    %c0_i32_0 = arith.constant 0 : i32
    %c0_i32_1 = arith.constant 0 : i32
    return %c0_i32, %c0_i32_0 : i32, i32
  }
  func.func @transform_3(%arg0: i32, %arg1: i32) -> (i32, i32) {
    %c0_i32 = arith.constant 0 : i32
    %c0_i32_0 = arith.constant 0 : i32
    %c0_i32_1 = arith.constant 0 : i32
    return %c0_i32, %c0_i32_0 : i32, i32
  }
  func.func @transform_4(%arg0: i32, %arg1: i32) -> (i32, i32) {
    %c0_i32 = arith.constant 0 : i32
    %c0_i32_0 = arith.constant 0 : i32
    %c0_i32_1 = arith.constant 0 : i32
    return %c0_i32, %c0_i32_0 : i32, i32
  }
  func.func @transform_5(%arg0: i32, %arg1: i32) -> (i32, i32) {
    %c0_i32 = arith.constant 0 : i32
    %c0_i32_0 = arith.constant 0 : i32
    %c0_i32_1 = arith.constant 0 : i32
    return %c0_i32, %c0_i32_0 : i32, i32
  }
  func.func @transform_6(%arg0: i32, %arg1: i32) -> (i32, i32) {
    %c0_i32 = arith.constant 0 : i32
    %c0_i32_0 = arith.constant 0 : i32
    %c0_i32_1 = arith.constant 0 : i32
    return %c0_i32, %c0_i32_0 : i32, i32
  }
  func.func @transform_7(%arg0: i32, %arg1: i32) -> (i32, i32, i32) {
    %c0_i32 = arith.constant 0 : i32
    %c0_i32_0 = arith.constant 0 : i32
    return %arg0, %arg1, %c0_i32 : i32, i32, i32
  }
}

module attributes {stable_mosaic.version = 11 : i64} {
  func.func @mha_kernel(%arg0: i32, %arg1: i32, %arg2: memref<1x8x32xbf16, #tpu.memory_space<vmem>>, %arg3: memref<32x32xbf16, #tpu.memory_space<vmem>>, %arg4: memref<1x32xf32, #tpu.memory_space<vmem>>, %arg5: memref<32x64xbf16, #tpu.memory_space<vmem>>, %arg6: memref<1x64xf32, #tpu.memory_space<vmem>>, %arg7: memref<32x32xbf16, #tpu.memory_space<vmem>>, %arg8: memref<1x32xf32, #tpu.memory_space<vmem>>, %arg9: memref<1x8x32xf32, #tpu.memory_space<vmem>>, %arg10: memref<4x8x8xbf16, #tpu.memory_space<vmem>>, %arg11: memref<4x8x8xbf16, #tpu.memory_space<vmem>>) attributes {dimension_semantics = [#tpu.dimension_semantics<parallel>, #tpu.dimension_semantics<arbitrary>], iteration_bounds = array<i64: 2, 1>, scalar_prefetch = 0 : i64, scratch_operands = 2 : i64, tpu.core_type = #tpu.core_type<tc>, window_params = [{transform_indices = @transform_0, window_bounds = array<i64: 1, 8, 32>}, {pipeline_mode = #tpu.pipeline_mode<synchronous>, transform_indices = @transform_1, window_bounds = array<i64: 32, 32>}, {pipeline_mode = #tpu.pipeline_mode<synchronous>, transform_indices = @transform_2, window_bounds = array<i64: 1, 32>}, {pipeline_mode = #tpu.pipeline_mode<synchronous>, transform_indices = @transform_3, window_bounds = array<i64: 32, 64>}, {pipeline_mode = #tpu.pipeline_mode<synchronous>, transform_indices = @transform_4, window_bounds = array<i64: 1, 64>}, {pipeline_mode = #tpu.pipeline_mode<synchronous>, transform_indices = @transform_5, window_bounds = array<i64: 32, 32>}, {pipeline_mode = #tpu.pipeline_mode<synchronous>, transform_indices = @transform_6, window_bounds = array<i64: 1, 32>}, {transform_indices = @transform_7, window_bounds = array<i64: 1, 8, 32>}]} {
    %c8_i32 = arith.constant 8 : i32
    %0 = arith.muli %arg1, %c8_i32 : i32
    %1 = tpu.assume_multiple %0, 8 : i32
    %c0_i32 = arith.constant 0 : i32
    %2 = arith.cmpi eq, %arg1, %c0_i32 : i32
    %3 = arith.extui %2 : i1 to i32
    %c0_i32_0 = arith.constant 0 : i32
    %4 = arith.cmpi ne, %3, %c0_i32_0 : i32
    scf.if %4 {
      %c0_25 = arith.constant 0 : index
      %c0_26 = arith.constant 0 : index
      %c0_27 = arith.constant 0 : index
      %69 = vector.load %arg2[%c0_25, %c0_26, %c0_27] : memref<1x8x32xbf16, #tpu.memory_space<vmem>>, vector<1x8x32xbf16>
      %70 = vector.shape_cast %69 : vector<1x8x32xbf16> to vector<8x32xbf16>
      %c0_28 = arith.constant 0 : index
      %c0_29 = arith.constant 0 : index
      %71 = vector.load %arg5[%c0_28, %c0_29] : memref<32x64xbf16, #tpu.memory_space<vmem>>, vector<32x64xbf16>
      %cst_30 = arith.constant dense<0.000000e+00> : vector<8x64xf32>
      %72 = tpu.matmul %70, %71, %cst_30 {dimension_numbers = #tpu.dot_dimension_numbers<[1], [0], [0], [1], [0, 0, 1, 1], [], []>} : vector<8x32xbf16>, vector<32x64xbf16>, vector<8x64xf32> -> vector<8x64xf32>
      %c0_31 = arith.constant 0 : index
      %c0_32 = arith.constant 0 : index
      %73 = vector.load %arg6[%c0_31, %c0_32] : memref<1x64xf32, #tpu.memory_space<vmem>>, vector<1x64xf32>
      %74 = vector.broadcast %73 : vector<1x64xf32> to vector<8x64xf32>
      %75 = arith.addf %72, %74 : vector<8x64xf32>
      %76 = arith.truncf %75 : vector<8x64xf32> to vector<8x64xbf16>
      %77 = vector.extract_strided_slice %76 {offsets = [0, 0], sizes = [8, 8], strides = [1, 1]} : vector<8x64xbf16> to vector<8x8xbf16>
      %c0_33 = arith.constant 0 : index
      %c0_34 = arith.constant 0 : index
      %c0_35 = arith.constant 0 : index
      %78 = vector.load %arg10[%c0_33, %c0_34, %c0_35] : memref<4x8x8xbf16, #tpu.memory_space<vmem>>, vector<1x8x8xbf16>
      %79 = vector.shape_cast %78 : vector<1x8x8xbf16> to vector<8x8xbf16>
      %80 = vector.shape_cast %77 : vector<8x8xbf16> to vector<1x8x8xbf16>
      tpu.vector_store %arg10[%c0_33, %c0_34, %c0_35], %80 {strides = array<i32>} : memref<4x8x8xbf16, #tpu.memory_space<vmem>>, vector<1x8x8xbf16>,
      %81 = vector.extract_strided_slice %76 {offsets = [0, 32], sizes = [8, 8], strides = [1, 1]} : vector<8x64xbf16> to vector<8x8xbf16>
      %c0_36 = arith.constant 0 : index
      %c0_37 = arith.constant 0 : index
      %c0_38 = arith.constant 0 : index
      %82 = vector.load %arg11[%c0_36, %c0_37, %c0_38] : memref<4x8x8xbf16, #tpu.memory_space<vmem>>, vector<1x8x8xbf16>
      %83 = vector.shape_cast %82 : vector<1x8x8xbf16> to vector<8x8xbf16>
      %84 = vector.shape_cast %81 : vector<8x8xbf16> to vector<1x8x8xbf16>
      tpu.vector_store %arg11[%c0_36, %c0_37, %c0_38], %84 {strides = array<i32>} : memref<4x8x8xbf16, #tpu.memory_space<vmem>>, vector<1x8x8xbf16>,
      %85 = vector.extract_strided_slice %76 {offsets = [0, 8], sizes = [8, 8], strides = [1, 1]} : vector<8x64xbf16> to vector<8x8xbf16>
      %c1 = arith.constant 1 : index
      %c0_39 = arith.constant 0 : index
      %c0_40 = arith.constant 0 : index
      %86 = vector.load %arg10[%c1, %c0_39, %c0_40] : memref<4x8x8xbf16, #tpu.memory_space<vmem>>, vector<1x8x8xbf16>
      %87 = vector.shape_cast %86 : vector<1x8x8xbf16> to vector<8x8xbf16>
      %88 = vector.shape_cast %85 : vector<8x8xbf16> to vector<1x8x8xbf16>
      tpu.vector_store %arg10[%c1, %c0_39, %c0_40], %88 {strides = array<i32>} : memref<4x8x8xbf16, #tpu.memory_space<vmem>>, vector<1x8x8xbf16>,
      %89 = vector.extract_strided_slice %76 {offsets = [0, 40], sizes = [8, 8], strides = [1, 1]} : vector<8x64xbf16> to vector<8x8xbf16>
      %c1_41 = arith.constant 1 : index
      %c0_42 = arith.constant 0 : index
      %c0_43 = arith.constant 0 : index
      %90 = vector.load %arg11[%c1_41, %c0_42, %c0_43] : memref<4x8x8xbf16, #tpu.memory_space<vmem>>, vector<1x8x8xbf16>
      %91 = vector.shape_cast %90 : vector<1x8x8xbf16> to vector<8x8xbf16>
      %92 = vector.shape_cast %89 : vector<8x8xbf16> to vector<1x8x8xbf16>
      tpu.vector_store %arg11[%c1_41, %c0_42, %c0_43], %92 {strides = array<i32>} : memref<4x8x8xbf16, #tpu.memory_space<vmem>>, vector<1x8x8xbf16>,
      %93 = vector.extract_strided_slice %76 {offsets = [0, 16], sizes = [8, 8], strides = [1, 1]} : vector<8x64xbf16> to vector<8x8xbf16>
      %c2 = arith.constant 2 : index
      %c0_44 = arith.constant 0 : index
      %c0_45 = arith.constant 0 : index
      %94 = vector.load %arg10[%c2, %c0_44, %c0_45] : memref<4x8x8xbf16, #tpu.memory_space<vmem>>, vector<1x8x8xbf16>
      %95 = vector.shape_cast %94 : vector<1x8x8xbf16> to vector<8x8xbf16>
      %96 = vector.shape_cast %93 : vector<8x8xbf16> to vector<1x8x8xbf16>
      tpu.vector_store %arg10[%c2, %c0_44, %c0_45], %96 {strides = array<i32>} : memref<4x8x8xbf16, #tpu.memory_space<vmem>>, vector<1x8x8xbf16>,
      %97 = vector.extract_strided_slice %76 {offsets = [0, 48], sizes = [8, 8], strides = [1, 1]} : vector<8x64xbf16> to vector<8x8xbf16>
      %c2_46 = arith.constant 2 : index
      %c0_47 = arith.constant 0 : index
      %c0_48 = arith.constant 0 : index
      %98 = vector.load %arg11[%c2_46, %c0_47, %c0_48] : memref<4x8x8xbf16, #tpu.memory_space<vmem>>, vector<1x8x8xbf16>
      %99 = vector.shape_cast %98 : vector<1x8x8xbf16> to vector<8x8xbf16>
      %100 = vector.shape_cast %97 : vector<8x8xbf16> to vector<1x8x8xbf16>
      tpu.vector_store %arg11[%c2_46, %c0_47, %c0_48], %100 {strides = array<i32>} : memref<4x8x8xbf16, #tpu.memory_space<vmem>>, vector<1x8x8xbf16>,
      %101 = vector.extract_strided_slice %76 {offsets = [0, 24], sizes = [8, 8], strides = [1, 1]} : vector<8x64xbf16> to vector<8x8xbf16>
      %c3 = arith.constant 3 : index
      %c0_49 = arith.constant 0 : index
      %c0_50 = arith.constant 0 : index
      %102 = vector.load %arg10[%c3, %c0_49, %c0_50] : memref<4x8x8xbf16, #tpu.memory_space<vmem>>, vector<1x8x8xbf16>
      %103 = vector.shape_cast %102 : vector<1x8x8xbf16> to vector<8x8xbf16>
      %104 = vector.shape_cast %101 : vector<8x8xbf16> to vector<1x8x8xbf16>
      tpu.vector_store %arg10[%c3, %c0_49, %c0_50], %104 {strides = array<i32>} : memref<4x8x8xbf16, #tpu.memory_space<vmem>>, vector<1x8x8xbf16>,
      %105 = vector.extract_strided_slice %76 {offsets = [0, 56], sizes = [8, 8], strides = [1, 1]} : vector<8x64xbf16> to vector<8x8xbf16>
      %c3_51 = arith.constant 3 : index
      %c0_52 = arith.constant 0 : index
      %c0_53 = arith.constant 0 : index
      %106 = vector.load %arg11[%c3_51, %c0_52, %c0_53] : memref<4x8x8xbf16, #tpu.memory_space<vmem>>, vector<1x8x8xbf16>
      %107 = vector.shape_cast %106 : vector<1x8x8xbf16> to vector<8x8xbf16>
      %108 = vector.shape_cast %105 : vector<8x8xbf16> to vector<1x8x8xbf16>
      tpu.vector_store %arg11[%c3_51, %c0_52, %c0_53], %108 {strides = array<i32>} : memref<4x8x8xbf16, #tpu.memory_space<vmem>>, vector<1x8x8xbf16>,
    } else {
    }
    %c0 = arith.constant 0 : index
    %5 = arith.index_cast %1 : i32 to index
    %c0_1 = arith.constant 0 : index
    %6 = vector.load %arg2[%c0, %5, %c0_1] : memref<1x8x32xbf16, #tpu.memory_space<vmem>>, vector<1x8x32xbf16>
    %7 = vector.shape_cast %6 : vector<1x8x32xbf16> to vector<8x32xbf16>
    %c0_2 = arith.constant 0 : index
    %c0_3 = arith.constant 0 : index
    %8 = vector.load %arg3[%c0_2, %c0_3] : memref<32x32xbf16, #tpu.memory_space<vmem>>, vector<32x32xbf16>
    %cst = arith.constant dense<0.000000e+00> : vector<8x32xf32>
    %9 = tpu.matmul %7, %8, %cst {dimension_numbers = #tpu.dot_dimension_numbers<[1], [0], [0], [1], [0, 0, 1, 1], [], []>} : vector<8x32xbf16>, vector<32x32xbf16>, vector<8x32xf32> -> vector<8x32xf32>
    %c0_4 = arith.constant 0 : index
    %c0_5 = arith.constant 0 : index
    %10 = vector.load %arg4[%c0_4, %c0_5] : memref<1x32xf32, #tpu.memory_space<vmem>>, vector<1x32xf32>
    %11 = vector.broadcast %10 : vector<1x32xf32> to vector<8x32xf32>
    %12 = arith.addf %9, %11 : vector<8x32xf32>
    %13 = arith.truncf %12 : vector<8x32xf32> to vector<8x32xbf16>
    %14 = vector.extract_strided_slice %13 {offsets = [0, 0], sizes = [8, 8], strides = [1, 1]} : vector<8x32xbf16> to vector<8x8xbf16>
    %15 = vector.extract_strided_slice %13 {offsets = [0, 8], sizes = [8, 8], strides = [1, 1]} : vector<8x32xbf16> to vector<8x8xbf16>
    %16 = vector.extract_strided_slice %13 {offsets = [0, 16], sizes = [8, 8], strides = [1, 1]} : vector<8x32xbf16> to vector<8x8xbf16>
    %17 = vector.extract_strided_slice %13 {offsets = [0, 24], sizes = [8, 8], strides = [1, 1]} : vector<8x32xbf16> to vector<8x8xbf16>
    %18 = vector.shape_cast %14 : vector<8x8xbf16> to vector<1x8x8xbf16>
    %19 = vector.shape_cast %15 : vector<8x8xbf16> to vector<1x8x8xbf16>
    %20 = vector.shape_cast %16 : vector<8x8xbf16> to vector<1x8x8xbf16>
    %21 = vector.shape_cast %17 : vector<8x8xbf16> to vector<1x8x8xbf16>
    %22 = tpu.concatenate %18, %19, %20, %21 in 0 : vector<1x8x8xbf16>, vector<1x8x8xbf16>, vector<1x8x8xbf16>, vector<1x8x8xbf16> -> vector<4x8x8xbf16>
    %c0_6 = arith.constant 0 : index
    %c0_7 = arith.constant 0 : index
    %c0_8 = arith.constant 0 : index
    %23 = vector.load %arg10[%c0_6, %c0_7, %c0_8] : memref<4x8x8xbf16, #tpu.memory_space<vmem>>, vector<4x8x8xbf16>
    %c0_9 = arith.constant 0 : index
    %c0_10 = arith.constant 0 : index
    %c0_11 = arith.constant 0 : index
    %24 = vector.load %arg11[%c0_9, %c0_10, %c0_11] : memref<4x8x8xbf16, #tpu.memory_space<vmem>>, vector<4x8x8xbf16>
    "tpu.trace_start"() <{level = 10 : i32, message = "hqe,hse->hqs"}> : () -> ()
    %cst_12 = arith.constant dense<0.000000e+00> : vector<4x8x8xf32>
    %25 = tpu.matmul %22, %23, %cst_12 {dimension_numbers = #tpu.dot_dimension_numbers<[2], [2], [1], [1], [0, 0, 0, 1, 1, 1], [0], [0]>} : vector<4x8x8xbf16>, vector<4x8x8xbf16>, vector<4x8x8xf32> -> vector<4x8x8xf32>
    "tpu.trace_stop"() : () -> ()
    %26 = tpu.iota {dimensions = array<i32: 0>} : vector<8x8xi32>
    %27 = vector.broadcast %1 : i32 to vector<8x8xi32>
    %28 = arith.addi %26, %27 : vector<8x8xi32>
    %29 = tpu.iota {dimensions = array<i32: 1>} : vector<8x8xi32>
    %30 = arith.cmpi sge, %28, %29 : vector<8x8xi32>
    %31 = vector.shape_cast %30 : vector<8x8xi1> to vector<1x8x8xi1>
    %cst_13 = arith.constant -1.000000e+30 : f32
    %32 = vector.shape_cast %31 : vector<1x8x8xi1> to vector<1x8x8xi1>
    %33 = vector.broadcast %32 : vector<1x8x8xi1> to vector<4x8x8xi1>
    %34 = vector.broadcast %cst_13 : f32 to vector<4x8x8xf32>
    %35 = arith.select %33, %25, %34 : vector<4x8x8xi1>, vector<4x8x8xf32>
    %cst_14 = arith.constant dense<0xFF800000> : vector<4x8xf32>
    %36 = vector.multi_reduction <maximumf>, %35, %cst_14 [2] : vector<4x8x8xf32> to vector<4x8xf32>
    %37 = vector.shape_cast %36 : vector<4x8xf32> to vector<4x8x1xf32>
    %38 = vector.broadcast %37 : vector<4x8x1xf32> to vector<4x8x8xf32>
    %39 = arith.subf %35, %38 : vector<4x8x8xf32>
    %40 = math.exp %39 : vector<4x8x8xf32>
    %cst_15 = arith.constant dense<0.000000e+00> : vector<4x8xf32>
    %41 = vector.multi_reduction <add>, %40, %cst_15 [2] : vector<4x8x8xf32> to vector<4x8xf32>
    %42 = vector.shape_cast %41 : vector<4x8xf32> to vector<4x8x1xf32>
    %43 = tpu.reciprocal %42 {approx = true} : vector<4x8x1xf32> -> vector<4x8x1xf32>
    %44 = vector.broadcast %43 : vector<4x8x1xf32> to vector<4x8x8xf32>
    %45 = arith.mulf %40, %44 : vector<4x8x8xf32>
    %46 = arith.truncf %45 : vector<4x8x8xf32> to vector<4x8x8xbf16>
    "tpu.trace_start"() <{level = 10 : i32, message = "hqs,hse->hqe"}> : () -> ()
    %cst_16 = arith.constant dense<0.000000e+00> : vector<4x8x8xf32>
    %47 = tpu.matmul %46, %24, %cst_16 {dimension_numbers = #tpu.dot_dimension_numbers<[2], [1], [1], [2], [0, 0, 0, 1, 1, 2], [0], [0]>} : vector<4x8x8xbf16>, vector<4x8x8xbf16>, vector<4x8x8xf32> -> vector<4x8x8xf32>
    "tpu.trace_stop"() : () -> ()
    %48 = vector.extract_strided_slice %47 {offsets = [0, 0, 0], sizes = [1, 8, 8], strides = [1, 1, 1]} : vector<4x8x8xf32> to vector<1x8x8xf32>
    %49 = vector.shape_cast %48 : vector<1x8x8xf32> to vector<8x8xf32>
    %50 = arith.truncf %49 : vector<8x8xf32> to vector<8x8xbf16>
    %51 = vector.extract_strided_slice %47 {offsets = [1, 0, 0], sizes = [1, 8, 8], strides = [1, 1, 1]} : vector<4x8x8xf32> to vector<1x8x8xf32>
    %52 = vector.shape_cast %51 : vector<1x8x8xf32> to vector<8x8xf32>
    %53 = arith.truncf %52 : vector<8x8xf32> to vector<8x8xbf16>
    %54 = vector.extract_strided_slice %47 {offsets = [2, 0, 0], sizes = [1, 8, 8], strides = [1, 1, 1]} : vector<4x8x8xf32> to vector<1x8x8xf32>
    %55 = vector.shape_cast %54 : vector<1x8x8xf32> to vector<8x8xf32>
    %56 = arith.truncf %55 : vector<8x8xf32> to vector<8x8xbf16>
    %57 = vector.extract_strided_slice %47 {offsets = [3, 0, 0], sizes = [1, 8, 8], strides = [1, 1, 1]} : vector<4x8x8xf32> to vector<1x8x8xf32>
    %58 = vector.shape_cast %57 : vector<1x8x8xf32> to vector<8x8xf32>
    %59 = arith.truncf %58 : vector<8x8xf32> to vector<8x8xbf16>
    %60 = tpu.concatenate %50, %53, %56, %59 in 1 : vector<8x8xbf16>, vector<8x8xbf16>, vector<8x8xbf16>, vector<8x8xbf16> -> vector<8x32xbf16>
    %c0_17 = arith.constant 0 : index
    %c0_18 = arith.constant 0 : index
    %61 = vector.load %arg7[%c0_17, %c0_18] : memref<32x32xbf16, #tpu.memory_space<vmem>>, vector<32x32xbf16>
    %cst_19 = arith.constant dense<0.000000e+00> : vector<8x32xf32>
    %62 = tpu.matmul %60, %61, %cst_19 {dimension_numbers = #tpu.dot_dimension_numbers<[1], [0], [0], [1], [0, 0, 1, 1], [], []>} : vector<8x32xbf16>, vector<32x32xbf16>, vector<8x32xf32> -> vector<8x32xf32>
    %c0_20 = arith.constant 0 : index
    %c0_21 = arith.constant 0 : index
    %63 = vector.load %arg8[%c0_20, %c0_21] : memref<1x32xf32, #tpu.memory_space<vmem>>, vector<1x32xf32>
    %64 = vector.broadcast %63 : vector<1x32xf32> to vector<8x32xf32>
    %65 = arith.addf %62, %64 : vector<8x32xf32>
    %c0_22 = arith.constant 0 : index
    %c0_23 = arith.constant 0 : index
    %c0_24 = arith.constant 0 : index
    %66 = vector.load %arg9[%c0_22, %c0_23, %c0_24] : memref<1x8x32xf32, #tpu.memory_space<vmem>>, vector<1x8x32xf32>
    %67 = vector.shape_cast %66 : vector<1x8x32xf32> to vector<8x32xf32>
    %68 = vector.shape_cast %65 : vector<8x32xf32> to vector<1x8x32xf32>
    tpu.vector_store %arg9[%c0_22, %c0_23, %c0_24], %68 {strides = array<i32>} : memref<1x8x32xf32, #tpu.memory_space<vmem>>, vector<1x8x32xf32>,
    return
  }
  func.func @transform_0(%arg0: i32, %arg1: i32) -> (i32, i32, i32) {
    %c0_i32 = arith.constant 0 : i32
    %c0_i32_0 = arith.constant 0 : i32
    %c0_i32_1 = arith.constant 0 : i32
    return %arg0, %c0_i32, %c0_i32_0 : i32, i32, i32
  }
  func.func @transform_1(%arg0: i32, %arg1: i32) -> (i32, i32) {
    %c0_i32 = arith.constant 0 : i32
    %c0_i32_0 = arith.constant 0 : i32
    %c0_i32_1 = arith.constant 0 : i32
    return %c0_i32, %c0_i32_0 : i32, i32
  }
  func.func @transform_2(%arg0: i32, %arg1: i32) -> (i32, i32) {
    %c0_i32 = arith.constant 0 : i32
    %c0_i32_0 = arith.constant 0 : i32
    %c0_i32_1 = arith.constant 0 : i32
    return %c0_i32, %c0_i32_0 : i32, i32
  }
  func.func @transform_3(%arg0: i32, %arg1: i32) -> (i32, i32) {
    %c0_i32 = arith.constant 0 : i32
    %c0_i32_0 = arith.constant 0 : i32
    %c0_i32_1 = arith.constant 0 : i32
    return %c0_i32, %c0_i32_0 : i32, i32
  }
  func.func @transform_4(%arg0: i32, %arg1: i32) -> (i32, i32) {
    %c0_i32 = arith.constant 0 : i32
    %c0_i32_0 = arith.constant 0 : i32
    %c0_i32_1 = arith.constant 0 : i32
    return %c0_i32, %c0_i32_0 : i32, i32
  }
  func.func @transform_5(%arg0: i32, %arg1: i32) -> (i32, i32) {
    %c0_i32 = arith.constant 0 : i32
    %c0_i32_0 = arith.constant 0 : i32
    %c0_i32_1 = arith.constant 0 : i32
    return %c0_i32, %c0_i32_0 : i32, i32
  }
  func.func @transform_6(%arg0: i32, %arg1: i32) -> (i32, i32) {
    %c0_i32 = arith.constant 0 : i32
    %c0_i32_0 = arith.constant 0 : i32
    %c0_i32_1 = arith.constant 0 : i32
    return %c0_i32, %c0_i32_0 : i32, i32
  }
  func.func @transform_7(%arg0: i32, %arg1: i32) -> (i32, i32, i32) {
    %c0_i32 = arith.constant 0 : i32
    %c0_i32_0 = arith.constant 0 : i32
    return %arg0, %arg1, %c0_i32 : i32, i32, i32
  }
}

</mosaic_0001>

<bundles_post_ra>
// kernel: tpu_custom_call.1
= control target key start
LH: loop header
LB: loop body
LE: loop exit
PB: predicated region body
PF: predicated region fallthrough
CT: control target
= control target key end

     0   :  { %s2015_s0 = inlined_call_operand.hbm [shape: bf16[2,8,32], index: 0, kind: input, shape index: {}]   ;;  %s2016_s1 = inlined_call_operand.hbm [shape: bf16[32,32], index: 1, kind: input, shape index: {}]   ;;  %s2017_s2 = inlined_call_operand.vmem [shape: f32[1,32], index: 2, kind: input, shape index: {}]   ;;  %s2018_s3 = inlined_call_operand.hbm [shape: bf16[32,64], index: 3, kind: input, shape index: {}]   ;;  %s2019_s4 = inlined_call_operand.vmem [shape: f32[1,64], index: 4, kind: input, shape index: {}]   ;;  %s2020_s5 = inlined_call_operand.hbm [shape: bf16[32,32], index: 5, kind: input, shape index: {}]   ;;  %s2021_s6 = inlined_call_operand.vmem [shape: f32[1,32], index: 6, kind: input, shape index: {}]   ;;  %s2022_s7 = inlined_call_operand.hbm [shape: f32[2,8,32], index: 7, kind: output, shape index: {}]  }
   0x1   :  { %2027 = sst [smem:[#allocation17_spill]] %s2016_s1 }
   0x2   :  { %2028 = sst [smem:[#allocation18_spill]] %s2018_s3 }
   0x3   :  { %2029 = sst [smem:[#allocation19_spill]] %s2020_s5 }
   0x4   :  { %12 = vsyncpa [#allocation5], 0 }
   0x5   :  { %14 = vsyncpa [#allocation5 + $0x1], 0 }
   0x6   :  { %15 = vsyncpa [#allocation8], 0 }
   0x7   :  { %16 = vsyncpa [#allocation11], 0 }
   0x8   :  { %17 = vsyncpa [#allocation6], 0 }
   0x9   :  { %19 = vsyncpa [#allocation6 + $0x1], 0  ;;  %s1720_s24 = smov 0   ;;  %s1722_s25 = smov 0  }
   0xa   :  { %s1724_s26 = smov 0   ;;  %s1726_s27 = smov 0  }
   0xb   :  { %s1728_s28 = smov 0   ;;  %s1730_s29 = smov 0  }
   0xc LB: > { %s1198_s30 = sadd.s32 4294967295, %s1659_s29   ;;  %s1199_s8 = sadd.s32 4294967294, %s1659_s29   ;;  %s1659_s29 = sphi %s1730_s29, %s25_s29   ;;  %s1655_s28 = sphi %s1728_s28, %s2050_s28   ;;  %s1651_s27 = sphi %s1726_s27, %s2049_s27   ;;  %s1647_s26 = sphi %s1724_s26, %s2048_s26   ;;  %s1643_s25 = sphi %s1722_s25, %s2047_s25   ;;  %s1639_s24 = sphi %s1720_s24, %s2046_s24  }
   0xd   : > { %p57_p0 = scmp.ne.s32.totalorder %s1643_s25, %s1639_s24  ;;  %p1754_p1 = scmp.eq.s32.totalorder %s1198_s30, 0 }
   0xe   : > { %p1758_p2 = scmp.eq.s32.totalorder %s1198_s30, 1  ;;  %p215_p3 = scmp.eq.s32.totalorder %s1199_s8, 1 }
   0xf   : > { %s2030_s9 = scalar_select %p1754_p1, 1, 0 }
  0x10   : > { %p1764_p4 = por %p1754_p1, %p57_p0  ;;  %p1200_p5 = scmp.ge.s32.totalorder %s1659_s29, 1 }
  0x11   : > { %p1769_p6 = por %p215_p3, %p57_p0  ;;  %p222_p7 = scmp.lt.s32.totalorder %s1659_s29, 3 }
  0x12   : > { %s2032_s11 = scalar_select %p1764_p4, 1, 0 }
  0x13   : > { %s2033_s12 = scalar_select %p1769_p6, 1, 0 }
  0x14   : > { %p1774_p8 = pnand %p1200_p5, %p222_p7  ;;  %s1661_s14 = smov [#allocation7]  }
  0x15   : > { %s234_s15 = sshll.u32 %s1661_s14, 4  ;;  %s1662_s17 = smov [#allocation9]   ;;  %s235_s15 = int_to_ptr.vmem [resolvable:$true] %s234_s15 }
  0x16   : > { %s2034_s13 = scalar_select %p1774_p8, 1, 0 }
  0x17   : > { %p1352_p9 = pneg %p1774_p8  ;;  %s250_s18 = sshll.u32 %s1662_s17, 4  ;;  %s251_s18 = int_to_ptr.vmem [resolvable:$true] %s250_s18 }
  0x18   : > { %s1663_s19 = smov [#allocation10]   ;;  %s1476_s21 = scalar_lea.vmem %s235_s15, 256 }
  0x19   : > { %p1783_p11 = pnand %p1352_p9, %p1754_p1  ;;  %s266_s20 = sshll.u32 %s1663_s19, 4  ;;  %s267_s20 = int_to_ptr.vmem [resolvable:$true] %s266_s20 }
  0x1a   : > { %p1477_p13 = scmp.ne.s32.totalorder %s235_s15, %s1476_s21  ;;  %p1484_p5 = scmp.lt.s32.totalorder %s235_s15, %s235_s15 }
  0x1b   : > { %p1467_p12 = pneg %p1783_p11  ;;  %p1485_p7 = scmp.lt.s32.totalorder %s1476_s21, %s1476_s21 }
  0x1d   : > { %p1479_p0 = pnand %p1477_p13, %p1467_p12  ;;  %p1486_p9 = por %p1485_p7, %p1484_p5 }
  0x1f   : > { %p1480_p3 = pneg %p1479_p0 }
  0x21   : > { %p1487_p10 = pnand %p1486_p9, %p1480_p3 }
  0x23   : > { %1490 = shalt.err (!%p1487_p10)
}
  0x24   : > { %s1664_s22 = smov 64   ;;  %s1665_s23 = smov 4  }
  0x25   : > { %s2036_s1 = sld [smem:[#allocation17_spill]]  ;;  %s1502_s14 = scalar_lea.vmem %s251_s18, 256 }
  0x26   : > { %p1503_p6 = scmp.ne.s32.totalorder %s251_s18, %s1502_s14  ;;  %p1510_p1 = scmp.lt.s32.totalorder %s251_s18, %s251_s18 }
  0x27   : > { %p1511_p4 = scmp.lt.s32.totalorder %s1502_s14, %s1502_s14 }
  0x28   : > { %p1505_p13 = pnand %p1503_p6, %p1467_p12 }
  0x29   : > { %p1512_p5 = por %p1511_p4, %p1510_p1 }
  0x2a   : > { %p1506_p0 = pneg %p1505_p13 }
  0x2b   : > { %1355 = dma.hbm_to_vmem [thread:$0]  (!%p1783_p11), %s2036_s1, 256, %s235_s15, [#allocation8], %s1664_s22, %s1664_s22, %s1665_s23  }
  0x2c   : > { %p1513_p3 = pnand %p1512_p5, %p1506_p0 }
  0x2e   : > { %1516 = shalt.err (!%p1513_p3)
}
  0x2f   : > { %s2037_s3 = sld [smem:[#allocation18_spill]]  ;;  %s1528_s15 = scalar_lea.vmem %s267_s20, 256 }
  0x30   : > { %p1529_p10 = scmp.ne.s32.totalorder %s267_s20, %s1528_s15  ;;  %p1536_p9 = scmp.lt.s32.totalorder %s267_s20, %s267_s20 }
  0x31   : > { %p1537_p13 = scmp.lt.s32.totalorder %s1528_s15, %s1528_s15 }
  0x32   : > { %p1531_p7 = pnand %p1529_p10, %p1467_p12 }
  0x33   : > { %p1538_p8 = por %p1537_p13, %p1536_p9 }
  0x34   : > { %p1532_p6 = pneg %p1531_p7 }
  0x35   : > { %1358 = dma.hbm_to_vmem [thread:$0]  (!%p1783_p11), %s2037_s3, 256, %s251_s18, [#allocation8], %s1664_s22, %s1664_s22, %s1665_s23  }
  0x36   : > { %p1539_p1 = pnand %p1538_p8, %p1532_p6 }
  0x38   : > { %1542 = shalt.err (!%p1539_p1)
}
  0x39   : > { %s2038_s5 = sld [smem:[#allocation19_spill]]  ;;  %s44_s18 = sadd.s32 1, %s1647_s26 }
  0x3a   : > { %s37_s8 = sadd.s32 1, %s1655_s28  ;;  %p51_p4 = scmp.ne.s32.totalorder %s1647_s26, %s1643_s25 }
  0x3b   : > { %p39_p8 = scmp.ge.s32.totalorder %s37_s8, 2  ;;  %p52_p12 = scmp.eq.s32.totalorder %s1659_s29, 0 }
  0x3c   : > { %p1820_p0 = por %p1758_p2, %p51_p4  ;;  %p1373_p5 = scmp.lt.s32.totalorder %s1659_s29, 2 }
  0x3d   : > { %s2052_s8 = smov (%p39_p8, %s37_s8), 0  ;;  %p53_p3 = por %p52_p12, %p51_p4 }
  0x3e   : > { %s283_s14 = sand.u32 1, %s1647_s26   ;;  %s41_s17 = ssub.s32 %s1655_s28, %s2052_s8 }
  0x3f   : > { %1361 = dma.hbm_to_vmem [thread:$0]  (!%p1783_p11), %s2038_s5, 256, %s267_s20, [#allocation11], %s1664_s22, %s1664_s22, %s1665_s23  }
  0x40   : > { %p42_p10 = scmp.eq.s32.totalorder %s41_s17, 0  ;;  %s1205_s20 = sshll.u32 %s283_s14, 2 }
  0x41   : > { %s1206_s22 = sshll.u32 %s1655_s28, 6  ;;  %s287_s21 = scalar_lea.vmem [#allocation4], %s1205_s20 }
  0x42   : > { %s1832_s23 = scalar_select %p42_p10, %s1647_s26, %s44_s18  }
  0x43   : > { %s292_s10 = scalar_lea.hbm %s2015_s0, %s1206_s22  ;;  %s294_s30 = sshll.u32 %s287_s21, 4  ;;  %s295_s30 = int_to_ptr.vmem [resolvable:$true] %s294_s30 }
  0x44   : > { %p1839_p2 = pnand %p1373_p5, %p53_p3  ;;  %s284_s3 = scalar_lea.sflag [#allocation5], %s283_s14 }
  0x45   : > { %s1556_s17 = scalar_lea.vmem %s295_s30, 64  ;;  %s1666_s18 = smov [#allocation4]  }
  0x46   : > { %p1545_p11 = pneg %p1839_p2  ;;  %p1557_p7 = scmp.ne.s32.totalorder %s295_s30, %s1556_s17 }
  0x47   : > { %s1561_s5 = sshll.u32 %s1666_s18, 4  ;;  %s1562_s5 = int_to_ptr.vmem [resolvable:$false] %s1561_s5 }
  0x48   : > { %p1559_p6 = pnand %p1557_p7, %p1545_p11  ;;  %s1563_s22 = scalar_lea.vmem %s1562_s5, 128 }
  0x49   : > { %p1564_p13 = scmp.lt.s32.totalorder %s295_s30, %s1562_s5  ;;  %p1565_p1 = scmp.lt.s32.totalorder %s1563_s22, %s1556_s17 }
  0x4a   : > { %p1560_p9 = pneg %p1559_p6 }
  0x4b   : > { %p1566_p4 = por %p1565_p1, %p1564_p13 }
  0x4d   : > { %p1567_p8 = pnand %p1566_p4, %p1560_p9 }
  0x4f   : > { %1570 = shalt.err (!%p1567_p8)
}
  0x50   : > { %1365 = dma.hbm_to_vmem [thread:$0]  (!%p1839_p2), %s292_s10, 64, %s295_s30, %s284_s3  }
  0x51   : > { %p2041_p12 = scmp.ne.s32.totalorder %s2034_s13, 0 }
  0x52   : > { %s1850_s14 = sand.u32 (!%p2041_p12), 1, %s1643_s25   ;;  %p2042_p5 = scmp.ne.s32.totalorder (!%p2041_p12), %s2032_s11, 0 }
  0x53   : > { %303 = sbr.rel (%p2041_p12) target bundleno = 1474 (0x5c2), region = 48  ;;  %s1208_s20 = sshll.u32 (!%p2041_p12), %s1850_s14, 2 }
  0x54   : > { %s306_s19 = scalar_lea.sflag (!%p2041_p12), [#allocation5], %s1850_s14  ;;  %s309_s15 = scalar_lea.vmem (!%p2041_p12), [#allocation4], %s1208_s20 }
  0x58   : > { %1622 = dma.done.wait (%p2042_p5), %s306_s19, 64  }
  0x59   : > { %1624 = vsyncadd (%p2042_p5), %s306_s19, 4294967232  ;;  %p2043_p3 = scmp.ne.s32.totalorder %s2030_s9, 0 }
  0x5b   : > { %1626 = dma.done.wait (%p2043_p3), [#allocation8], 512  }
  0x5c   : > { %1628 = vsyncadd (%p2043_p3), [#allocation8], 4294966784 }
  0x5d   : > { %1630 = dma.done.wait (%p2043_p3), [#allocation11], 256  }
  0x5e   : > { %1632 = vsyncadd (%p2043_p3), [#allocation11], 4294967040  ;;  %v1667_v0 = vmov 0.0   ;;  %vm1668_vm0 = vmmov 0   ;;  %v1443_v1 = vld [vmem:[#allocation9 + $0x8] sm:$0xff]   ;;  %v1444_v2 = vld [vmem:[#allocation9] sm:$0xff]   ;;  %v739_v35 = vlaneseq }
  0x5f   : > { %1264 = vmatprep.subr.bf16.mxu0 %v1667_v0  ;;  %1268 = vmatprep.mubr.msk.bf16.mxu0 %vm1668_vm0, %v1667_v0  ;;  %v1445_v3 = vld [vmem:[#allocation7 + $0x8] sm:$0xff]   ;;  %v1446_v4 = vld [vmem:[#allocation7] sm:$0xff]   ;;  %v358_v5 = vld [vmem:[%s309_s15] sm:$0xf]  ;;  %vm382_vm1 = vcmask 261120   ;;  %vm427_vm2 = vcmask 60416  }
  0x60   : > { %1272 = vmatprep.subr.bf16.mxu1 %v1667_v0  ;;  %1276 = vmatprep.mubr.msk.bf16.mxu1 %vm1668_vm0, %v1667_v0  ;;  %v470_v6 = vld [vmem:[%s309_s15] sm:$0xf]  ;;  %s1669_s11 = smov 104   ;;  %s1670_s13 = smov 120   ;;  %vm554_vm3 = vcmask 64512   ;;  %v740_v36 = vshrl.u32 %v739_v35, 7 }
  0x61   : > { %1265 = vmatpush3.bf16.msra.mxu0 %v1443_v1  ;;  %1273 = vmatpush3.bf16.msra.mxu1 %v1445_v3  ;;  %v1213_v7 = vld [vmem:[%s2019_s4] ss:$0 sm:$0xff]  ;;  %s1671_s10 = smov 112   ;;  %v744_v37 = vand.u32 127, %v739_v35  ;;  %s1672_s21 = smov 96   ;;  %vm803_vm5 = vcmask 1043456  }
  0x62   : > { %1266 = vmatprep.subr.bf16.mxu0 %v1667_v0  ;;  %1274 = vmatprep.subr.bf16.mxu1 %v1667_v0  ;;  %v1218_v10 = vld [vmem:[%s2017_s2] ss:$0 sm:$0xff]  ;;  %s1673_s30 = smov 80   ;;  %s1674_s17 = smov 72   ;;  %vm1001_vm6 = vcmask 130048   ;;  %vm1004_vm7 = vcmask 195584  }
  0x63   : > { %vm745_vm4 = vcmp.ge.s32.totalorder %v740_v36, %v744_v37  ;;  %s1675_s18 = smov 88   ;;  %s1676_s22 = smov 16  }
  0x64   : > { %s1677_s20 = smov 8   ;;  %s1678_s19 = smov 24  }
  0x65   : > { %1267 = vmatpush3.bf16.msra.mxu0 %v1444_v2  ;;  %1275 = vmatpush3.bf16.msra.mxu1 %v1446_v4  ;;  %s1212_s15 = sshll.u32 %s1850_s14, 3  ;;  %s1235_s5 = sshll.u32 %s1651_s27, 7 }
  0x66   : > { %1280 = vmatprep.subr.bf16.mxu0 %v1667_v0  ;;  %1286 = vmatprep.subr.bf16.mxu1 %v1667_v0  ;;  %s351_s9 = scalar_lea.vmem [#allocation12], %s1212_s15 }
  0x68   : > { %1269 = vmatmul.mubr.msk.bf16.vlgmr.msra.gmra.mxu0 %vm382_vm1, %v358_v5  ;;  %1277 = vmatmul.mubr.msk.bf16.vlgmr.msra.gmra.mxu1 %vm382_vm1, %v470_v6 }
  0x69   : > { %1282 = vmatprep.mubr.msk.bf16.mxu0 %vm1668_vm0, %v1667_v0  ;;  %1288 = vmatprep.mubr.msk.bf16.mxu1 %vm1668_vm0, %v1667_v0 }
 0x128   : > { %v420_v8 = vpop.f32.mrf.mxu0  ;;  %v532_v13 = vpop.f32.mrf.mxu1 }
 0x129   : > { %v421_v9 = vadd.f32 %v1213_v7, %v420_v8  ;;  %v533_v15 = vadd.f32 %v1218_v10, %v532_v13 }
 0x12a   : > { %v1270_v11 = vpop.f32.mrf.mxu0  ;;  %v1278_v16 = vpop.f32.mrf.mxu1 }
 0x12b   : > { %v1888_v12 = vpack.c.bf16 %v421_v9, %v421_v9  ;;  %v538_v18 = vpack.c.bf16 %v533_v15, %v533_v15 }
 0x12c   : > { %v423_v14 = vpop.f32.mrf.mxu0  ;;  %v535_v19 = vpop.f32.mrf.mxu1 }
 0x12d   : > { %428 = vst.msk [vmem:[#allocation2] sm:$0xf] %vm427_vm2, %v1888_v12  ;;  %456 = vrot.lane.b32.xlu1 %v1888_v12, %s1669_s11  ;;  %436 = vrot.lane.b32.xlu0 %v1888_v12, %s1670_s13 }
 0x12e   : > { %v1271_v17 = vpop.f32.mrf.mxu0  ;;  %v1279_v20 = vpop.f32.mrf.mxu1 }
 0x131   : > { %446 = vrot.lane.b32.xlu0 %v1888_v12, %s1671_s10  ;;  %540 = vrot.lane.b32.xlu1 %v538_v18, %s1670_s13 }
 0x134   : > { %v546_v21 = vld [vmem:[#allocation2] sm:$0xf] }
 0x135   : > { %v559_v22 = vsel %vm554_vm3, %v546_v21, 0  ;;  %544 = vrot.lane.b32.xlu1 %v538_v18, %s1669_s11  ;;  %542 = vrot.lane.b32.xlu0 %v538_v18, %s1671_s10  ;;  %s1088_s11 = sshll.u32 %s351_s9, 4  ;;  %s1968_s11 = int_to_ptr.vmem [resolvable:$true] %s1088_s11 }
 0x136   : > { %1281 = vmatpush3.bf16.xpose.msra.mxu0 %v559_v22  ;;  %s1571_s27 = scalar_lea.vmem %s1968_s11, 128 }
 0x137   : > { %1292 = vmatprep.subr.bf16.mxu0 %v1667_v0  ;;  %p1572_p10 = scmp.ne.s32.totalorder %s1968_s11, %s1571_s27 }
 0x139   : > { %p1573_p2 = pnand %p1572_p10, %p1820_p0 }
 0x13b   : > { %p1574_p11 = pneg %p1573_p2 }
 0x13d   : > { %1283 = vmatmul.mubr.msk.bf16.vlgmr.msra.gmra.mxu0 %vm554_vm3, %v538_v18 }
 0x13e   : > { %1294 = vmatprep.mubr.msk.bf16.mxu0 %vm1668_vm0, %v1667_v0 }
 0x19f   : > { %v457_v23 = vpop.permute.xlu1 %456  ;;  %v437_v24 = vpop.permute.xlu0 %436 }
 0x1a0   : > { %460 = vst.msk [vmem:[#allocation2 + $0xc] sm:$0xf] %vm427_vm2, %v457_v23  ;;  %440 = vst.msk [vmem:[#allocation2 + $0x4] sm:$0xf] %vm427_vm2, %v437_v24 }
 0x1a3   : > { %v447_v25 = vpop.permute.xlu0 %446  ;;  %v541_v31 = vpop.permute.xlu1 %540 }
 0x1a4   : > { %450 = vst.msk [vmem:[#allocation2 + $0x8] sm:$0xf] %vm427_vm2, %v447_v25 }
 0x1a7   : > { %v547_v26 = vld [vmem:[#allocation2 + $0x4] sm:$0xf]  ;;  %v549_v30 = vld [vmem:[#allocation2 + $0xc] sm:$0xf]  ;;  %v543_v33 = vpop.permute.xlu0 %542  ;;  %v545_v34 = vpop.permute.xlu1 %544 }
 0x1a8   : > { %v605_v27 = vsel %vm554_vm3, %v547_v26, 0  ;;  %v697_v32 = vsel %vm554_vm3, %v549_v30, 0 }
 0x1a9   : > { %1287 = vmatpush3.bf16.xpose.msra.mxu1 %v605_v27 }
 0x1aa   : > { %1298 = vmatprep.subr.bf16.mxu1 %v1667_v0 }
 0x1ab   : > { %v548_v28 = vld [vmem:[#allocation2 + $0x8] sm:$0xf] }
 0x1ac   : > { %v651_v29 = vsel %vm554_vm3, %v548_v28, 0 }
 0x1ad   : > { %1293 = vmatpush3.bf16.xpose.msra.mxu0 %v651_v29 }
 0x1ae   : > { %1304 = vmatprep.subr.bf16.mxu0 %v1667_v0 }
 0x1b0   : > { %1289 = vmatmul.mubr.msk.bf16.vlgmr.msra.gmra.mxu1 %vm554_vm3, %v541_v31 }
 0x1b1   : > { %1299 = vmatpush3.bf16.xpose.msra.mxu1 %v697_v32  ;;  %1300 = vmatprep.mubr.msk.bf16.mxu1 %vm1668_vm0, %v1667_v0 }
 0x1b2   : > { %1310 = vmatprep.subr.bf16.mxu1 %v1667_v0 }
 0x1b4   : > { %1295 = vmatmul.mubr.msk.bf16.vlgmr.msra.gmra.mxu0 %vm554_vm3, %v543_v33 }
 0x1b5   : > { %1306 = vmatprep.mubr.msk.bf16.mxu0 %vm1668_vm0, %v1667_v0 }
 0x1b8   : > { %1301 = vmatmul.mubr.msk.bf16.vlgmr.msra.gmra.mxu1 %vm554_vm3, %v545_v34 }
 0x1b9   : > { %1312 = vmatprep.mubr.msk.bf16.mxu1 %vm1668_vm0, %v1667_v0 }
 0x1fd   : > { %v595_v38 = vpop.f32.mrf.mxu0 }
 0x1fe   : > { %v748_v39 = vsel %vm745_vm4, %v595_v38, -1e+30 }
 0x1ff   : > { %v1284_v40 = vpop.f32.mrf.mxu0  ;;  %v752_v41 = vsel %vm554_vm3, %v748_v39, -inf }
 0x200   : > { %753 = vmax.xlane.f32.xlu0 %v752_v41 }
 0x201   : > { %v598_v42 = vpop.f32.mrf.mxu0 }
 0x203   : > { %v1285_v43 = vpop.f32.mrf.mxu0 }
 0x270   : > { %v641_v44 = vpop.f32.mrf.mxu1 }
 0x271   : > { %v749_v45 = vsel %vm745_vm4, %v641_v44, -1e+30 }
 0x272   : > { %v1290_v46 = vpop.f32.mrf.mxu1  ;;  %v755_v47 = vsel %vm554_vm3, %v749_v45, -inf }
 0x273   : > { %756 = vmax.xlane.f32.xlu1 %v755_v47 }
 0x274   : > { %v644_v48 = vpop.f32.mrf.mxu1  ;;  %v687_v49 = vpop.f32.mrf.mxu0 }
 0x275   : > { %v750_v50 = vsel %vm745_vm4, %v687_v49, -1e+30 }
 0x276   : > { %v1291_v51 = vpop.f32.mrf.mxu1  ;;  %v1296_v52 = vpop.f32.mrf.mxu0  ;;  %v758_v53 = vsel %vm554_vm3, %v750_v50, -inf }
 0x277   : > { %759 = vmax.xlane.f32.xlu0 %v758_v53  ;;  %v1447_v51 = vld [vmem:[#allocation10 + $0x8] sm:$0xff]   ;;  %v1448_v52 = vld [vmem:[#allocation10] sm:$0xff]  }
 0x278   : > { %v690_v54 = vpop.f32.mrf.mxu0  ;;  %v733_v55 = vpop.f32.mrf.mxu1 }
 0x279   : > { %v751_v56 = vsel %vm745_vm4, %v733_v55, -1e+30 }
 0x27a   : > { %v1297_v57 = vpop.f32.mrf.mxu0  ;;  %v1302_v58 = vpop.f32.mrf.mxu1  ;;  %v761_v59 = vsel %vm554_vm3, %v751_v56, -inf }
 0x27b   : > { %762 = vmax.xlane.f32.xlu0 %v761_v59 }
 0x27c   : > { %v736_v60 = vpop.f32.mrf.mxu1 }
 0x27e   : > { %v1303_v61 = vpop.f32.mrf.mxu1 }
 0x284   : > { %432 = vrot.lane.b32.xlu1 %v1888_v12, %s1672_s21  ;;  %s1966_s21 = scalar_lea.hbm %s2022_s7, %s1235_s5 }
 0x289   : > { %v754_v62 = vpop.xlane.xlu0 %753 }
 0x28a   : > { %v764_v63 = vsub.f32 %v748_v39, %v754_v62 }
 0x28c   : > { %v768_v1 = vmul.f32 1.442695, %v764_v63 }
 0x28e   : > { %1449 = vpow2.f32 %v768_v1 }
 0x29b   : > { %v1450_v2 = vpop.eup %1449 }
 0x29c   : > { %v776_v3 = vsel %vm554_vm3, %v1450_v2, 0.0 }
 0x2a8   : > { %777 = vadd.xlane.f32.xlu1 %v776_v3 }
 0x2fc   : > { %v757_v4 = vpop.xlane.xlu1 %756 }
 0x2fd   : > { %v765_v5 = vsub.f32 %v749_v45, %v757_v4 }
 0x2ff   : > { %v770_v6 = vmul.f32 1.442695, %v765_v5 }
 0x300   : > { %v433_v7 = vpop.permute.xlu1 %432  ;;  %v760_v8 = vpop.xlane.xlu0 %759 }
 0x301   : > { %1451 = vpow2.f32 %v770_v6  ;;  %435 = vst.msk [vmem:[#allocation3] sm:$0xf] %vm427_vm2, %v433_v7  ;;  %v766_v9 = vsub.f32 %v750_v50, %v760_v8 }
 0x303   : > { %v772_v10 = vmul.f32 1.442695, %v766_v9 }
 0x304   : > { %v763_v11 = vpop.xlane.xlu0 %762 }
 0x305   : > { %1453 = vpow2.f32 %v772_v10  ;;  %v767_v13 = vsub.f32 %v751_v56, %v763_v11  ;;  %v1230_v11 = vld [vmem:[%s2021_s6] ss:$0 sm:$0xff] }
 0x307   : > { %v774_v14 = vmul.f32 1.442695, %v767_v13 }
 0x308   : > { %v550_v15 = vld [vmem:[#allocation3] sm:$0xf] }
 0x309   : > { %1455 = vpow2.f32 %v774_v14  ;;  %v805_v16 = vsel %vm803_vm5, %v550_v15, 0 }
 0x30a   : > { %1305 = vmatpush3.bf16.msra.mxu0 %v805_v16 }
 0x30b   : > { %1316 = vmatprep.subr.bf16.mxu0 %v1667_v0 }
 0x30e   : > { %v1452_v17 = vpop.eup %1451 }
 0x30f   : > { %v779_v18 = vsel %vm554_vm3, %v1452_v17, 0.0 }
 0x310   : > { %780 = vadd.xlane.f32.xlu0 %v779_v18 }
 0x312   : > { %v1454_v19 = vpop.eup %1453 }
 0x313   : > { %v782_v20 = vsel %vm554_vm3, %v1454_v19, 0.0 }
 0x314   : > { %783 = vadd.xlane.f32.xlu1 %v782_v20 }
 0x316   : > { %v1456_v21 = vpop.eup %1455 }
 0x317   : > { %v785_v22 = vsel %vm554_vm3, %v1456_v21, 0.0 }
 0x318   : > { %786 = vadd.xlane.f32.xlu0 %v785_v22 }
 0x325   : > { %451 = vrot.lane.b32.xlu1 %v1888_v12, %s1673_s30  ;;  %s1074_s30 = scalar_lea.sflag [#allocation6], %s1850_s14 }
 0x329   : > { %461 = vrot.lane.b32.xlu1 %v1888_v12, %s1674_s17  ;;  %s1679_s17 = smov [#allocation12]  }
 0x32e   : > { %441 = vrot.lane.b32.xlu0 %v1888_v12, %s1675_s18  ;;  %s1575_s18 = sshll.u32 %s1679_s17, 4  ;;  %s1576_s18 = int_to_ptr.vmem [resolvable:$false] %s1575_s18 }
 0x32f   : > { %p1578_p7 = scmp.lt.s32.totalorder %s1968_s11, %s1576_s18 }
 0x331   : > { %v778_v23 = vpop.xlane.xlu1 %777 }
 0x332   : > { %1457 = vrcp.f32 %v778_v23 }
 0x33f   : > { %v1458_v24 = vpop.eup %1457 }
 0x340   : > { %v792_v25 = vmul.f32 %v1458_v24, %v1450_v2 }
 0x342   : > { %v796_v26 = vpack.c.bf16 %v792_v25, %v792_v25 }
 0x344   : > { %1307 = vmatmul.mubr.msk.bf16.vlgmr.msra.gmra.mxu0 %vm554_vm3, %v796_v26 }
 0x345   : > { %1318 = vmatprep.mubr.msk.bf16.mxu0 %vm1668_vm0, %v1667_v0 }
 0x399   : > { %v781_v27 = vpop.xlane.xlu0 %780 }
 0x39a   : > { %1459 = vrcp.f32 %v781_v27 }
 0x39d   : > { %v784_v28 = vpop.xlane.xlu1 %783 }
 0x39e   : > { %1461 = vrcp.f32 %v784_v28 }
 0x3a1   : > { %v452_v29 = vpop.permute.xlu1 %451  ;;  %v787_v30 = vpop.xlane.xlu0 %786 }
 0x3a2   : > { %455 = vst.msk [vmem:[#allocation3 + $0x8] sm:$0xf] %vm427_vm2, %v452_v29  ;;  %1463 = vrcp.f32 %v787_v30 }
 0x3a5   : > { %v462_v12 = vpop.permute.xlu1 %461  ;;  %v442_v31 = vpop.permute.xlu0 %441 }
 0x3a6   : > { %465 = vst.msk [vmem:[#allocation3 + $0xc] sm:$0xf] %vm427_vm2, %v462_v12  ;;  %445 = vst.msk [vmem:[#allocation3 + $0x4] sm:$0xf] %vm427_vm2, %v442_v31 }
 0x3a7   : > { %v1460_v32 = vpop.eup %1459 }
 0x3a8   : > { %v793_v37 = vmul.f32 %v1460_v32, %v1452_v17 }
 0x3a9   : > { %v552_v33 = vld [vmem:[#allocation3 + $0x8] sm:$0xf] }
 0x3aa   : > { %v897_v34 = vsel %vm803_vm5, %v552_v33, 0  ;;  %v797_v42 = vpack.c.bf16 %v793_v37, %v793_v37 }
 0x3ab   : > { %v1462_v35 = vpop.eup %1461  ;;  %1317 = vmatpush3.bf16.msra.mxu0 %v897_v34 }
 0x3ac   : > { %v794_v36 = vmul.f32 %v1462_v35, %v1454_v19  ;;  %1328 = vmatprep.subr.bf16.mxu0 %v1667_v0 }
 0x3ad   : > { %v551_v38 = vld [vmem:[#allocation3 + $0x4] sm:$0xf]  ;;  %v553_v41 = vld [vmem:[#allocation3 + $0xc] sm:$0xf] }
 0x3ae   : > { %v851_v39 = vsel %vm803_vm5, %v551_v38, 0  ;;  %v798_v40 = vpack.c.bf16 %v794_v36, %v794_v36  ;;  %v943_v44 = vsel %vm803_vm5, %v553_v41, 0 }
 0x3af   : > { %1311 = vmatpush3.bf16.msra.mxu1 %v851_v39  ;;  %v1464_v43 = vpop.eup %1463 }
 0x3b0   : > { %1319 = vmatmul.mubr.msk.bf16.vlgmr.msra.gmra.mxu0 %vm554_vm3, %v798_v40  ;;  %1322 = vmatprep.subr.bf16.mxu1 %v1667_v0  ;;  %v795_v45 = vmul.f32 %v1464_v43, %v1456_v21 }
 0x3b1   : > { %1332 = vmatprep.mubr.msk.bf16.mxu0 %vm1668_vm0, %v1667_v0  ;;  %1329 = vmatpush3.bf16.msra.mxu0 %v1447_v51 }
 0x3b2   : > { %1313 = vmatmul.mubr.msk.bf16.vlgmr.msra.gmra.mxu1 %vm554_vm3, %v797_v42  ;;  %v799_v46 = vpack.c.bf16 %v795_v45, %v795_v45  ;;  %1330 = vmatprep.subr.bf16.mxu0 %v1667_v0 }
 0x3b3   : > { %1323 = vmatpush3.bf16.msra.mxu1 %v943_v44  ;;  %1324 = vmatprep.mubr.msk.bf16.mxu1 %vm1668_vm0, %v1667_v0 }
 0x3b5   : > { %1331 = vmatpush3.bf16.msra.mxu0 %v1448_v52 }
 0x3ba   : > { %1325 = vmatmul.mubr.msk.bf16.vlgmr.msra.gmra.mxu1 %vm554_vm3, %v799_v46 }
 0x404   : > { %v841_v47 = vpop.f32.mrf.mxu0 }
 0x405   : > { %v985_v5 = vpack.c.bf16 %v841_v47, %v841_v47 }
 0x406   : > { %v1308_v48 = vpop.f32.mrf.mxu0 }
 0x408   : > { %v844_v49 = vpop.f32.mrf.mxu0 }
 0x40a   : > { %v1309_v50 = vpop.f32.mrf.mxu0 }
 0x470   : > { %v933_v53 = vpop.f32.mrf.mxu0 }
 0x471   : > { %v987_v54 = vpack.c.bf16 %v933_v53, %v933_v53 }
 0x472   : > { %v887_v55 = vpop.f32.mrf.mxu1  ;;  %v1320_v56 = vpop.f32.mrf.mxu0 }
 0x473   : > { %v986_v57 = vpack.c.bf16 %v887_v55, %v887_v55  ;;  %993 = vrot.lane.b32.xlu1 %v987_v54, %s1676_s22  ;;  %s1577_s22 = scalar_lea.vmem %s1576_s18, 256 }
 0x474   : > { %v1314_v58 = vpop.f32.mrf.mxu1  ;;  %v936_v59 = vpop.f32.mrf.mxu0  ;;  %p1579_p6 = scmp.lt.s32.totalorder %s1577_s22, %s1571_s27 }
 0x475   : > { %990 = vrot.lane.b32.xlu0 %v986_v57, %s1677_s20 }
 0x476   : > { %v890_v60 = vpop.f32.mrf.mxu1  ;;  %v1321_v61 = vpop.f32.mrf.mxu0  ;;  %p1580_p9 = por %p1579_p6, %p1578_p7 }
 0x478   : > { %v1315_v62 = vpop.f32.mrf.mxu1  ;;  %p1581_p13 = pnand %p1580_p9, %p1574_p11 }
 0x47a   : > { %v979_v63 = vpop.f32.mrf.mxu1 }
 0x47b   : > { %v988_v1 = vpack.c.bf16 %v979_v63, %v979_v63 }
 0x47c   : > { %v1326_v2 = vpop.f32.mrf.mxu1 }
 0x47d   : > { %996 = vrot.lane.b32.xlu0 %v988_v1, %s1678_s19 }
 0x47e   : > { %v982_v0 = vpop.f32.mrf.mxu1 }
 0x480   : > { %v1327_v3 = vpop.f32.mrf.mxu1 }
 0x4e5   : > { %v994_v7 = vpop.permute.xlu1 %993 }
 0x4e7   : > { %v991_v4 = vpop.permute.xlu0 %990 }
 0x4e8   : > { %v1000_v6 = vsel %vm554_vm3, %v985_v5, %v991_v4 }
 0x4e9   : > { %v1003_v9 = vsel %vm1001_vm6, %v1000_v6, %v994_v7 }
 0x4ef   : > { %v997_v8 = vpop.permute.xlu0 %996 }
 0x4f0   : > { %v1006_v10 = vsel %vm1004_vm7, %v1003_v9, %v997_v8 }
 0x4f1   : > { %1333 = vmatmul.mubr.msk.bf16.vlgmr.msra.gmra.mxu0 %vm382_vm1, %v1006_v10 }
 0x5b1   : > { %v1066_v13 = vpop.f32.mrf.mxu0 }
 0x5b2   : > { %v1067_v14 = vadd.f32 %v1230_v11, %v1066_v13 }
 0x5b3   : > { %v1334_v15 = vpop.f32.mrf.mxu0 }
 0x5b4   : > { %1072 = vst.msk [vmem:[%s351_s9] sm:$0xff] %vm382_vm1, %v1067_v14 }
 0x5b5   : > { %v1069_v16 = vpop.f32.mrf.mxu0 }
 0x5b6   : > { %1584 = shalt.err (!%p1581_p13)
}
 0x5b7   : > { %s1585_s20 = scalar_lea.hbm %s1966_s21, 128  ;;  %s1589_s15 = scalar_lea.hbm %s2022_s7, 256 }
 0x5b8   : > { %p1586_p1 = scmp.ne.s32.totalorder %s1966_s21, %s1585_s20  ;;  %p1590_p12 = scmp.lt.s32.totalorder %s1966_s21, %s2022_s7 }
 0x5b9   : > { %p1591_p5 = scmp.lt.s32.totalorder %s1589_s15, %s1585_s20 }
 0x5ba   : > { %p1587_p4 = pnand %p1586_p1, %p1820_p0 }
 0x5bb   : > { %p1592_p3 = por %p1591_p5, %p1590_p12 }
 0x5bc   : > { %p1588_p8 = pneg %p1587_p4 }
 0x5be   : > { %p1593_p10 = pnand %p1592_p3, %p1588_p8 }
 0x5c0   : > { %1596 = shalt.err (!%p1593_p10)
}
 0x5c1   : > { %1350 = dma.vmem_to_hbm [thread:$0]  (%p1820_p0), %s1968_s11, 128, %s1966_s21, %s1074_s30   ;;  %v1335_v17 = vpop.f32.mrf.mxu0 }
 0x5c2 PF: > { %s1100_s5 = sand.u32 1, %s1639_s24   ;;  %p2044_p2 = scmp.ne.s32.totalorder %s2033_s12, 0 }
 0x5c3   : > { %p2045_p11 = scmp.ge.s32.totalorder %s1659_s29, 2  ;;  %s1101_s9 = scalar_lea.sflag [#allocation6], %s1100_s5 }
 0x5c5   : > { %p1367_p7 = pnand %p2045_p11, %p2044_p2 }
 0x5c7   : > { %p1368_p6 = pneg %p1367_p7 }
 0x5c9   : > { %1634 = dma.done.wait (%p1368_p6), %s1101_s9, 128  }
 0x5ca   : > { %1636 = vsyncadd (%p1368_p6), %s1101_s9, 4294967168  ;;  %s25_s29 = sadd.s32 1, %s1659_s29   ;;  %s2046_s24 = smov %s1643_s25 }
 0x5cb   : > { %p22_p9 = scmp.ge.s32.totalorder %s25_s29, 4   ;;  %s2047_s25 = smov %s1647_s26 }
 0x5cc   : > { %s2048_s26 = smov %s1832_s23  ;;  %s2049_s27 = smov %s1655_s28 }
 0x5cd   : > { %s2050_s28 = smov %s2052_s8  ;;  %24 = sbr.rel (!%p22_p9) target bundleno = 12 (0xc), region = 116 }
 0x5d2   :  { %1106 = vsyncpa [#allocation5], 1 }
 0x5d3   :  { %1108 = vsyncpa [#allocation5 + $0x1], 1 }
 0x5d4   :  { %1109 = vsyncpa [#allocation8], 1 }
 0x5d5   :  { %1110 = vsyncpa [#allocation11], 1 }
 0x5d6   :  { %1111 = vsyncpa [#allocation6], 1 }
 0x5d7   :  { %1113 = vsyncpa [#allocation6 + $0x1], 1 }

// kernel: tpu_custom_call.1
= control target key start
LH: loop header
LB: loop body
LE: loop exit
PB: predicated region body
PF: predicated region fallthrough
CT: control target
= control target key end

     0   :  { %s2015_s0 = inlined_call_operand.hbm [shape: bf16[2,8,32], index: 0, kind: input, shape index: {}]   ;;  %s2016_s1 = inlined_call_operand.hbm [shape: bf16[32,32], index: 1, kind: input, shape index: {}]   ;;  %s2017_s2 = inlined_call_operand.vmem [shape: f32[1,32], index: 2, kind: input, shape index: {}]   ;;  %s2018_s3 = inlined_call_operand.hbm [shape: bf16[32,64], index: 3, kind: input, shape index: {}]   ;;  %s2019_s4 = inlined_call_operand.vmem [shape: f32[1,64], index: 4, kind: input, shape index: {}]   ;;  %s2020_s5 = inlined_call_operand.hbm [shape: bf16[32,32], index: 5, kind: input, shape index: {}]   ;;  %s2021_s6 = inlined_call_operand.vmem [shape: f32[1,32], index: 6, kind: input, shape index: {}]   ;;  %s2022_s7 = inlined_call_operand.hbm [shape: f32[2,8,32], index: 7, kind: output, shape index: {}]  }
   0x1   :  { %2027 = sst [smem:[#allocation17_spill]] %s2016_s1 }
   0x2   :  { %2028 = sst [smem:[#allocation18_spill]] %s2018_s3 }
   0x3   :  { %2029 = sst [smem:[#allocation19_spill]] %s2020_s5 }
   0x4   :  { %12 = vsyncpa [#allocation5], 0 }
   0x5   :  { %14 = vsyncpa [#allocation5 + $0x1], 0 }
   0x6   :  { %15 = vsyncpa [#allocation8], 0 }
   0x7   :  { %16 = vsyncpa [#allocation11], 0 }
   0x8   :  { %17 = vsyncpa [#allocation6], 0 }
   0x9   :  { %19 = vsyncpa [#allocation6 + $0x1], 0  ;;  %s1720_s24 = smov 0   ;;  %s1722_s25 = smov 0  }
   0xa   :  { %s1724_s26 = smov 0   ;;  %s1726_s27 = smov 0  }
   0xb   :  { %s1728_s28 = smov 0   ;;  %s1730_s29 = smov 0  }
   0xc LB: > { %s1198_s30 = sadd.s32 4294967295, %s1659_s29   ;;  %s1199_s8 = sadd.s32 4294967294, %s1659_s29   ;;  %s1659_s29 = sphi %s1730_s29, %s25_s29   ;;  %s1655_s28 = sphi %s1728_s28, %s2050_s28   ;;  %s1651_s27 = sphi %s1726_s27, %s2049_s27   ;;  %s1647_s26 = sphi %s1724_s26, %s2048_s26   ;;  %s1643_s25 = sphi %s1722_s25, %s2047_s25   ;;  %s1639_s24 = sphi %s1720_s24, %s2046_s24  }
   0xd   : > { %p57_p0 = scmp.ne.s32.totalorder %s1643_s25, %s1639_s24  ;;  %p1754_p1 = scmp.eq.s32.totalorder %s1198_s30, 0 }
   0xe   : > { %p1758_p2 = scmp.eq.s32.totalorder %s1198_s30, 1  ;;  %p215_p3 = scmp.eq.s32.totalorder %s1199_s8, 1 }
   0xf   : > { %s2030_s9 = scalar_select %p1754_p1, 1, 0 }
  0x10   : > { %p1764_p4 = por %p1754_p1, %p57_p0  ;;  %p1200_p5 = scmp.ge.s32.totalorder %s1659_s29, 1 }
  0x11   : > { %p1769_p6 = por %p215_p3, %p57_p0  ;;  %p222_p7 = scmp.lt.s32.totalorder %s1659_s29, 3 }
  0x12   : > { %s2032_s11 = scalar_select %p1764_p4, 1, 0 }
  0x13   : > { %s2033_s12 = scalar_select %p1769_p6, 1, 0 }
  0x14   : > { %p1774_p8 = pnand %p1200_p5, %p222_p7  ;;  %s1661_s14 = smov [#allocation7]  }
  0x15   : > { %s234_s15 = sshll.u32 %s1661_s14, 4  ;;  %s1662_s17 = smov [#allocation9]   ;;  %s235_s15 = int_to_ptr.vmem [resolvable:$true] %s234_s15 }
  0x16   : > { %s2034_s13 = scalar_select %p1774_p8, 1, 0 }
  0x17   : > { %p1352_p9 = pneg %p1774_p8  ;;  %s250_s18 = sshll.u32 %s1662_s17, 4  ;;  %s251_s18 = int_to_ptr.vmem [resolvable:$true] %s250_s18 }
  0x18   : > { %s1663_s19 = smov [#allocation10]   ;;  %s1476_s21 = scalar_lea.vmem %s235_s15, 256 }
  0x19   : > { %p1783_p11 = pnand %p1352_p9, %p1754_p1  ;;  %s266_s20 = sshll.u32 %s1663_s19, 4  ;;  %s267_s20 = int_to_ptr.vmem [resolvable:$true] %s266_s20 }
  0x1a   : > { %p1477_p13 = scmp.ne.s32.totalorder %s235_s15, %s1476_s21  ;;  %p1484_p5 = scmp.lt.s32.totalorder %s235_s15, %s235_s15 }
  0x1b   : > { %p1467_p12 = pneg %p1783_p11  ;;  %p1485_p7 = scmp.lt.s32.totalorder %s1476_s21, %s1476_s21 }
  0x1d   : > { %p1479_p0 = pnand %p1477_p13, %p1467_p12  ;;  %p1486_p9 = por %p1485_p7, %p1484_p5 }
  0x1f   : > { %p1480_p3 = pneg %p1479_p0 }
  0x21   : > { %p1487_p10 = pnand %p1486_p9, %p1480_p3 }
  0x23   : > { %1490 = shalt.err (!%p1487_p10)
}
  0x24   : > { %s1664_s22 = smov 64   ;;  %s1665_s23 = smov 4  }
  0x25   : > { %s2036_s1 = sld [smem:[#allocation17_spill]]  ;;  %s1502_s14 = scalar_lea.vmem %s251_s18, 256 }
  0x26   : > { %p1503_p6 = scmp.ne.s32.totalorder %s251_s18, %s1502_s14  ;;  %p1510_p1 = scmp.lt.s32.totalorder %s251_s18, %s251_s18 }
  0x27   : > { %p1511_p4 = scmp.lt.s32.totalorder %s1502_s14, %s1502_s14 }
  0x28   : > { %p1505_p13 = pnand %p1503_p6, %p1467_p12 }
  0x29   : > { %p1512_p5 = por %p1511_p4, %p1510_p1 }
  0x2a   : > { %p1506_p0 = pneg %p1505_p13 }
  0x2b   : > { %1355 = dma.hbm_to_vmem [thread:$0]  (!%p1783_p11), %s2036_s1, 256, %s235_s15, [#allocation8], %s1664_s22, %s1664_s22, %s1665_s23  }
  0x2c   : > { %p1513_p3 = pnand %p1512_p5, %p1506_p0 }
  0x2e   : > { %1516 = shalt.err (!%p1513_p3)
}
  0x2f   : > { %s2037_s3 = sld [smem:[#allocation18_spill]]  ;;  %s1528_s15 = scalar_lea.vmem %s267_s20, 256 }
  0x30   : > { %p1529_p10 = scmp.ne.s32.totalorder %s267_s20, %s1528_s15  ;;  %p1536_p9 = scmp.lt.s32.totalorder %s267_s20, %s267_s20 }
  0x31   : > { %p1537_p13 = scmp.lt.s32.totalorder %s1528_s15, %s1528_s15 }
  0x32   : > { %p1531_p7 = pnand %p1529_p10, %p1467_p12 }
  0x33   : > { %p1538_p8 = por %p1537_p13, %p1536_p9 }
  0x34   : > { %p1532_p6 = pneg %p1531_p7 }
  0x35   : > { %1358 = dma.hbm_to_vmem [thread:$0]  (!%p1783_p11), %s2037_s3, 256, %s251_s18, [#allocation8], %s1664_s22, %s1664_s22, %s1665_s23  }
  0x36   : > { %p1539_p1 = pnand %p1538_p8, %p1532_p6 }
  0x38   : > { %1542 = shalt.err (!%p1539_p1)
}
  0x39   : > { %s2038_s5 = sld [smem:[#allocation19_spill]]  ;;  %s44_s18 = sadd.s32 1, %s1647_s26 }
  0x3a   : > { %s37_s8 = sadd.s32 1, %s1655_s28  ;;  %p51_p4 = scmp.ne.s32.totalorder %s1647_s26, %s1643_s25 }
  0x3b   : > { %p39_p8 = scmp.ge.s32.totalorder %s37_s8, 2  ;;  %p52_p12 = scmp.eq.s32.totalorder %s1659_s29, 0 }
  0x3c   : > { %p1820_p0 = por %p1758_p2, %p51_p4  ;;  %p1373_p5 = scmp.lt.s32.totalorder %s1659_s29, 2 }
  0x3d   : > { %s2052_s8 = smov (%p39_p8, %s37_s8), 0  ;;  %p53_p3 = por %p52_p12, %p51_p4 }
  0x3e   : > { %s283_s14 = sand.u32 1, %s1647_s26   ;;  %s41_s17 = ssub.s32 %s1655_s28, %s2052_s8 }
  0x3f   : > { %1361 = dma.hbm_to_vmem [thread:$0]  (!%p1783_p11), %s2038_s5, 256, %s267_s20, [#allocation11], %s1664_s22, %s1664_s22, %s1665_s23  }
  0x40   : > { %p42_p10 = scmp.eq.s32.totalorder %s41_s17, 0  ;;  %s1205_s20 = sshll.u32 %s283_s14, 2 }
  0x41   : > { %s1206_s22 = sshll.u32 %s1655_s28, 6  ;;  %s287_s21 = scalar_lea.vmem [#allocation4], %s1205_s20 }
  0x42   : > { %s1832_s23 = scalar_select %p42_p10, %s1647_s26, %s44_s18  }
  0x43   : > { %s292_s10 = scalar_lea.hbm %s2015_s0, %s1206_s22  ;;  %s294_s30 = sshll.u32 %s287_s21, 4  ;;  %s295_s30 = int_to_ptr.vmem [resolvable:$true] %s294_s30 }
  0x44   : > { %p1839_p2 = pnand %p1373_p5, %p53_p3  ;;  %s284_s3 = scalar_lea.sflag [#allocation5], %s283_s14 }
  0x45   : > { %s1556_s17 = scalar_lea.vmem %s295_s30, 64  ;;  %s1666_s18 = smov [#allocation4]  }
  0x46   : > { %p1545_p11 = pneg %p1839_p2  ;;  %p1557_p7 = scmp.ne.s32.totalorder %s295_s30, %s1556_s17 }
  0x47   : > { %s1561_s5 = sshll.u32 %s1666_s18, 4  ;;  %s1562_s5 = int_to_ptr.vmem [resolvable:$false] %s1561_s5 }
  0x48   : > { %p1559_p6 = pnand %p1557_p7, %p1545_p11  ;;  %s1563_s22 = scalar_lea.vmem %s1562_s5, 128 }
  0x49   : > { %p1564_p13 = scmp.lt.s32.totalorder %s295_s30, %s1562_s5  ;;  %p1565_p1 = scmp.lt.s32.totalorder %s1563_s22, %s1556_s17 }
  0x4a   : > { %p1560_p9 = pneg %p1559_p6 }
  0x4b   : > { %p1566_p4 = por %p1565_p1, %p1564_p13 }
  0x4d   : > { %p1567_p8 = pnand %p1566_p4, %p1560_p9 }
  0x4f   : > { %1570 = shalt.err (!%p1567_p8)
}
  0x50   : > { %1365 = dma.hbm_to_vmem [thread:$0]  (!%p1839_p2), %s292_s10, 64, %s295_s30, %s284_s3  }
  0x51   : > { %p2041_p12 = scmp.ne.s32.totalorder %s2034_s13, 0 }
  0x52   : > { %s1850_s14 = sand.u32 (!%p2041_p12), 1, %s1643_s25   ;;  %p2042_p5 = scmp.ne.s32.totalorder (!%p2041_p12), %s2032_s11, 0 }
  0x53   : > { %303 = sbr.rel (%p2041_p12) target bundleno = 1474 (0x5c2), region = 48  ;;  %s1208_s20 = sshll.u32 (!%p2041_p12), %s1850_s14, 2 }
  0x54   : > { %s306_s19 = scalar_lea.sflag (!%p2041_p12), [#allocation5], %s1850_s14  ;;  %s309_s15 = scalar_lea.vmem (!%p2041_p12), [#allocation4], %s1208_s20 }
  0x58   : > { %1622 = dma.done.wait (%p2042_p5), %s306_s19, 64  }
  0x59   : > { %1624 = vsyncadd (%p2042_p5), %s306_s19, 4294967232  ;;  %p2043_p3 = scmp.ne.s32.totalorder %s2030_s9, 0 }
  0x5b   : > { %1626 = dma.done.wait (%p2043_p3), [#allocation8], 512  }
  0x5c   : > { %1628 = vsyncadd (%p2043_p3), [#allocation8], 4294966784 }
  0x5d   : > { %1630 = dma.done.wait (%p2043_p3), [#allocation11], 256  }
  0x5e   : > { %1632 = vsyncadd (%p2043_p3), [#allocation11], 4294967040  ;;  %v1667_v0 = vmov 0.0   ;;  %vm1668_vm0 = vmmov 0   ;;  %v1443_v1 = vld [vmem:[#allocation9 + $0x8] sm:$0xff]   ;;  %v1444_v2 = vld [vmem:[#allocation9] sm:$0xff]   ;;  %v739_v35 = vlaneseq }
  0x5f   : > { %1264 = vmatprep.subr.bf16.mxu0 %v1667_v0  ;;  %1268 = vmatprep.mubr.msk.bf16.mxu0 %vm1668_vm0, %v1667_v0  ;;  %v1445_v3 = vld [vmem:[#allocation7 + $0x8] sm:$0xff]   ;;  %v1446_v4 = vld [vmem:[#allocation7] sm:$0xff]   ;;  %v358_v5 = vld [vmem:[%s309_s15] sm:$0xf]  ;;  %vm382_vm1 = vcmask 261120   ;;  %vm427_vm2 = vcmask 60416  }
  0x60   : > { %1272 = vmatprep.subr.bf16.mxu1 %v1667_v0  ;;  %1276 = vmatprep.mubr.msk.bf16.mxu1 %vm1668_vm0, %v1667_v0  ;;  %v470_v6 = vld [vmem:[%s309_s15] sm:$0xf]  ;;  %s1669_s11 = smov 104   ;;  %s1670_s13 = smov 120   ;;  %vm554_vm3 = vcmask 64512   ;;  %v740_v36 = vshrl.u32 %v739_v35, 7 }
  0x61   : > { %1265 = vmatpush3.bf16.msra.mxu0 %v1443_v1  ;;  %1273 = vmatpush3.bf16.msra.mxu1 %v1445_v3  ;;  %v1213_v7 = vld [vmem:[%s2019_s4] ss:$0 sm:$0xff]  ;;  %s1671_s10 = smov 112   ;;  %v744_v37 = vand.u32 127, %v739_v35  ;;  %s1672_s21 = smov 96   ;;  %vm803_vm5 = vcmask 1043456  }
  0x62   : > { %1266 = vmatprep.subr.bf16.mxu0 %v1667_v0  ;;  %1274 = vmatprep.subr.bf16.mxu1 %v1667_v0  ;;  %v1218_v10 = vld [vmem:[%s2017_s2] ss:$0 sm:$0xff]  ;;  %s1673_s30 = smov 80   ;;  %s1674_s17 = smov 72   ;;  %vm1001_vm6 = vcmask 130048   ;;  %vm1004_vm7 = vcmask 195584  }
  0x63   : > { %vm745_vm4 = vcmp.ge.s32.totalorder %v740_v36, %v744_v37  ;;  %s1675_s18 = smov 88   ;;  %s1676_s22 = smov 16  }
  0x64   : > { %s1677_s20 = smov 8   ;;  %s1678_s19 = smov 24  }
  0x65   : > { %1267 = vmatpush3.bf16.msra.mxu0 %v1444_v2  ;;  %1275 = vmatpush3.bf16.msra.mxu1 %v1446_v4  ;;  %s1212_s15 = sshll.u32 %s1850_s14, 3  ;;  %s1235_s5 = sshll.u32 %s1651_s27, 7 }
  0x66   : > { %1280 = vmatprep.subr.bf16.mxu0 %v1667_v0  ;;  %1286 = vmatprep.subr.bf16.mxu1 %v1667_v0  ;;  %s351_s9 = scalar_lea.vmem [#allocation12], %s1212_s15 }
  0x68   : > { %1269 = vmatmul.mubr.msk.bf16.vlgmr.msra.gmra.mxu0 %vm382_vm1, %v358_v5  ;;  %1277 = vmatmul.mubr.msk.bf16.vlgmr.msra.gmra.mxu1 %vm382_vm1, %v470_v6 }
  0x69   : > { %1282 = vmatprep.mubr.msk.bf16.mxu0 %vm1668_vm0, %v1667_v0  ;;  %1288 = vmatprep.mubr.msk.bf16.mxu1 %vm1668_vm0, %v1667_v0 }
 0x128   : > { %v420_v8 = vpop.f32.mrf.mxu0  ;;  %v532_v13 = vpop.f32.mrf.mxu1 }
 0x129   : > { %v421_v9 = vadd.f32 %v1213_v7, %v420_v8  ;;  %v533_v15 = vadd.f32 %v1218_v10, %v532_v13 }
 0x12a   : > { %v1270_v11 = vpop.f32.mrf.mxu0  ;;  %v1278_v16 = vpop.f32.mrf.mxu1 }
 0x12b   : > { %v1888_v12 = vpack.c.bf16 %v421_v9, %v421_v9  ;;  %v538_v18 = vpack.c.bf16 %v533_v15, %v533_v15 }
 0x12c   : > { %v423_v14 = vpop.f32.mrf.mxu0  ;;  %v535_v19 = vpop.f32.mrf.mxu1 }
 0x12d   : > { %428 = vst.msk [vmem:[#allocation2] sm:$0xf] %vm427_vm2, %v1888_v12  ;;  %456 = vrot.lane.b32.xlu1 %v1888_v12, %s1669_s11  ;;  %436 = vrot.lane.b32.xlu0 %v1888_v12, %s1670_s13 }
 0x12e   : > { %v1271_v17 = vpop.f32.mrf.mxu0  ;;  %v1279_v20 = vpop.f32.mrf.mxu1 }
 0x131   : > { %446 = vrot.lane.b32.xlu0 %v1888_v12, %s1671_s10  ;;  %540 = vrot.lane.b32.xlu1 %v538_v18, %s1670_s13 }
 0x134   : > { %v546_v21 = vld [vmem:[#allocation2] sm:$0xf] }
 0x135   : > { %v559_v22 = vsel %vm554_vm3, %v546_v21, 0  ;;  %544 = vrot.lane.b32.xlu1 %v538_v18, %s1669_s11  ;;  %542 = vrot.lane.b32.xlu0 %v538_v18, %s1671_s10  ;;  %s1088_s11 = sshll.u32 %s351_s9, 4  ;;  %s1968_s11 = int_to_ptr.vmem [resolvable:$true] %s1088_s11 }
 0x136   : > { %1281 = vmatpush3.bf16.xpose.msra.mxu0 %v559_v22  ;;  %s1571_s27 = scalar_lea.vmem %s1968_s11, 128 }
 0x137   : > { %1292 = vmatprep.subr.bf16.mxu0 %v1667_v0  ;;  %p1572_p10 = scmp.ne.s32.totalorder %s1968_s11, %s1571_s27 }
 0x139   : > { %p1573_p2 = pnand %p1572_p10, %p1820_p0 }
 0x13b   : > { %p1574_p11 = pneg %p1573_p2 }
 0x13d   : > { %1283 = vmatmul.mubr.msk.bf16.vlgmr.msra.gmra.mxu0 %vm554_vm3, %v538_v18 }
 0x13e   : > { %1294 = vmatprep.mubr.msk.bf16.mxu0 %vm1668_vm0, %v1667_v0 }
 0x19f   : > { %v457_v23 = vpop.permute.xlu1 %456  ;;  %v437_v24 = vpop.permute.xlu0 %436 }
 0x1a0   : > { %460 = vst.msk [vmem:[#allocation2 + $0xc] sm:$0xf] %vm427_vm2, %v457_v23  ;;  %440 = vst.msk [vmem:[#allocation2 + $0x4] sm:$0xf] %vm427_vm2, %v437_v24 }
 0x1a3   : > { %v447_v25 = vpop.permute.xlu0 %446  ;;  %v541_v31 = vpop.permute.xlu1 %540 }
 0x1a4   : > { %450 = vst.msk [vmem:[#allocation2 + $0x8] sm:$0xf] %vm427_vm2, %v447_v25 }
 0x1a7   : > { %v547_v26 = vld [vmem:[#allocation2 + $0x4] sm:$0xf]  ;;  %v549_v30 = vld [vmem:[#allocation2 + $0xc] sm:$0xf]  ;;  %v543_v33 = vpop.permute.xlu0 %542  ;;  %v545_v34 = vpop.permute.xlu1 %544 }
 0x1a8   : > { %v605_v27 = vsel %vm554_vm3, %v547_v26, 0  ;;  %v697_v32 = vsel %vm554_vm3, %v549_v30, 0 }
 0x1a9   : > { %1287 = vmatpush3.bf16.xpose.msra.mxu1 %v605_v27 }
 0x1aa   : > { %1298 = vmatprep.subr.bf16.mxu1 %v1667_v0 }
 0x1ab   : > { %v548_v28 = vld [vmem:[#allocation2 + $0x8] sm:$0xf] }
 0x1ac   : > { %v651_v29 = vsel %vm554_vm3, %v548_v28, 0 }
 0x1ad   : > { %1293 = vmatpush3.bf16.xpose.msra.mxu0 %v651_v29 }
 0x1ae   : > { %1304 = vmatprep.subr.bf16.mxu0 %v1667_v0 }
 0x1b0   : > { %1289 = vmatmul.mubr.msk.bf16.vlgmr.msra.gmra.mxu1 %vm554_vm3, %v541_v31 }
 0x1b1   : > { %1299 = vmatpush3.bf16.xpose.msra.mxu1 %v697_v32  ;;  %1300 = vmatprep.mubr.msk.bf16.mxu1 %vm1668_vm0, %v1667_v0 }
 0x1b2   : > { %1310 = vmatprep.subr.bf16.mxu1 %v1667_v0 }
 0x1b4   : > { %1295 = vmatmul.mubr.msk.bf16.vlgmr.msra.gmra.mxu0 %vm554_vm3, %v543_v33 }
 0x1b5   : > { %1306 = vmatprep.mubr.msk.bf16.mxu0 %vm1668_vm0, %v1667_v0 }
 0x1b8   : > { %1301 = vmatmul.mubr.msk.bf16.vlgmr.msra.gmra.mxu1 %vm554_vm3, %v545_v34 }
 0x1b9   : > { %1312 = vmatprep.mubr.msk.bf16.mxu1 %vm1668_vm0, %v1667_v0 }
 0x1fd   : > { %v595_v38 = vpop.f32.mrf.mxu0 }
 0x1fe   : > { %v748_v39 = vsel %vm745_vm4, %v595_v38, -1e+30 }
 0x1ff   : > { %v1284_v40 = vpop.f32.mrf.mxu0  ;;  %v752_v41 = vsel %vm554_vm3, %v748_v39, -inf }
 0x200   : > { %753 = vmax.xlane.f32.xlu0 %v752_v41 }
 0x201   : > { %v598_v42 = vpop.f32.mrf.mxu0 }
 0x203   : > { %v1285_v43 = vpop.f32.mrf.mxu0 }
 0x270   : > { %v641_v44 = vpop.f32.mrf.mxu1 }
 0x271   : > { %v749_v45 = vsel %vm745_vm4, %v641_v44, -1e+30 }
 0x272   : > { %v1290_v46 = vpop.f32.mrf.mxu1  ;;  %v755_v47 = vsel %vm554_vm3, %v749_v45, -inf }
 0x273   : > { %756 = vmax.xlane.f32.xlu1 %v755_v47 }
 0x274   : > { %v644_v48 = vpop.f32.mrf.mxu1  ;;  %v687_v49 = vpop.f32.mrf.mxu0 }
 0x275   : > { %v750_v50 = vsel %vm745_vm4, %v687_v49, -1e+30 }
 0x276   : > { %v1291_v51 = vpop.f32.mrf.mxu1  ;;  %v1296_v52 = vpop.f32.mrf.mxu0  ;;  %v758_v53 = vsel %vm554_vm3, %v750_v50, -inf }
 0x277   : > { %759 = vmax.xlane.f32.xlu0 %v758_v53  ;;  %v1447_v51 = vld [vmem:[#allocation10 + $0x8] sm:$0xff]   ;;  %v1448_v52 = vld [vmem:[#allocation10] sm:$0xff]  }
 0x278   : > { %v690_v54 = vpop.f32.mrf.mxu0  ;;  %v733_v55 = vpop.f32.mrf.mxu1 }
 0x279   : > { %v751_v56 = vsel %vm745_vm4, %v733_v55, -1e+30 }
 0x27a   : > { %v1297_v57 = vpop.f32.mrf.mxu0  ;;  %v1302_v58 = vpop.f32.mrf.mxu1  ;;  %v761_v59 = vsel %vm554_vm3, %v751_v56, -inf }
 0x27b   : > { %762 = vmax.xlane.f32.xlu0 %v761_v59 }
 0x27c   : > { %v736_v60 = vpop.f32.mrf.mxu1 }
 0x27e   : > { %v1303_v61 = vpop.f32.mrf.mxu1 }
 0x284   : > { %432 = vrot.lane.b32.xlu1 %v1888_v12, %s1672_s21  ;;  %s1966_s21 = scalar_lea.hbm %s2022_s7, %s1235_s5 }
 0x289   : > { %v754_v62 = vpop.xlane.xlu0 %753 }
 0x28a   : > { %v764_v63 = vsub.f32 %v748_v39, %v754_v62 }
 0x28c   : > { %v768_v1 = vmul.f32 1.442695, %v764_v63 }
 0x28e   : > { %1449 = vpow2.f32 %v768_v1 }
 0x29b   : > { %v1450_v2 = vpop.eup %1449 }
 0x29c   : > { %v776_v3 = vsel %vm554_vm3, %v1450_v2, 0.0 }
 0x2a8   : > { %777 = vadd.xlane.f32.xlu1 %v776_v3 }
 0x2fc   : > { %v757_v4 = vpop.xlane.xlu1 %756 }
 0x2fd   : > { %v765_v5 = vsub.f32 %v749_v45, %v757_v4 }
 0x2ff   : > { %v770_v6 = vmul.f32 1.442695, %v765_v5 }
 0x300   : > { %v433_v7 = vpop.permute.xlu1 %432  ;;  %v760_v8 = vpop.xlane.xlu0 %759 }
 0x301   : > { %1451 = vpow2.f32 %v770_v6  ;;  %435 = vst.msk [vmem:[#allocation3] sm:$0xf] %vm427_vm2, %v433_v7  ;;  %v766_v9 = vsub.f32 %v750_v50, %v760_v8 }
 0x303   : > { %v772_v10 = vmul.f32 1.442695, %v766_v9 }
 0x304   : > { %v763_v11 = vpop.xlane.xlu0 %762 }
 0x305   : > { %1453 = vpow2.f32 %v772_v10  ;;  %v767_v13 = vsub.f32 %v751_v56, %v763_v11  ;;  %v1230_v11 = vld [vmem:[%s2021_s6] ss:$0 sm:$0xff] }
 0x307   : > { %v774_v14 = vmul.f32 1.442695, %v767_v13 }
 0x308   : > { %v550_v15 = vld [vmem:[#allocation3] sm:$0xf] }
 0x309   : > { %1455 = vpow2.f32 %v774_v14  ;;  %v805_v16 = vsel %vm803_vm5, %v550_v15, 0 }
 0x30a   : > { %1305 = vmatpush3.bf16.msra.mxu0 %v805_v16 }
 0x30b   : > { %1316 = vmatprep.subr.bf16.mxu0 %v1667_v0 }
 0x30e   : > { %v1452_v17 = vpop.eup %1451 }
 0x30f   : > { %v779_v18 = vsel %vm554_vm3, %v1452_v17, 0.0 }
 0x310   : > { %780 = vadd.xlane.f32.xlu0 %v779_v18 }
 0x312   : > { %v1454_v19 = vpop.eup %1453 }
 0x313   : > { %v782_v20 = vsel %vm554_vm3, %v1454_v19, 0.0 }
 0x314   : > { %783 = vadd.xlane.f32.xlu1 %v782_v20 }
 0x316   : > { %v1456_v21 = vpop.eup %1455 }
 0x317   : > { %v785_v22 = vsel %vm554_vm3, %v1456_v21, 0.0 }
 0x318   : > { %786 = vadd.xlane.f32.xlu0 %v785_v22 }
 0x325   : > { %451 = vrot.lane.b32.xlu1 %v1888_v12, %s1673_s30  ;;  %s1074_s30 = scalar_lea.sflag [#allocation6], %s1850_s14 }
 0x329   : > { %461 = vrot.lane.b32.xlu1 %v1888_v12, %s1674_s17  ;;  %s1679_s17 = smov [#allocation12]  }
 0x32e   : > { %441 = vrot.lane.b32.xlu0 %v1888_v12, %s1675_s18  ;;  %s1575_s18 = sshll.u32 %s1679_s17, 4  ;;  %s1576_s18 = int_to_ptr.vmem [resolvable:$false] %s1575_s18 }
 0x32f   : > { %p1578_p7 = scmp.lt.s32.totalorder %s1968_s11, %s1576_s18 }
 0x331   : > { %v778_v23 = vpop.xlane.xlu1 %777 }
 0x332   : > { %1457 = vrcp.f32 %v778_v23 }
 0x33f   : > { %v1458_v24 = vpop.eup %1457 }
 0x340   : > { %v792_v25 = vmul.f32 %v1458_v24, %v1450_v2 }
 0x342   : > { %v796_v26 = vpack.c.bf16 %v792_v25, %v792_v25 }
 0x344   : > { %1307 = vmatmul.mubr.msk.bf16.vlgmr.msra.gmra.mxu0 %vm554_vm3, %v796_v26 }
 0x345   : > { %1318 = vmatprep.mubr.msk.bf16.mxu0 %vm1668_vm0, %v1667_v0 }
 0x399   : > { %v781_v27 = vpop.xlane.xlu0 %780 }
 0x39a   : > { %1459 = vrcp.f32 %v781_v27 }
 0x39d   : > { %v784_v28 = vpop.xlane.xlu1 %783 }
 0x39e   : > { %1461 = vrcp.f32 %v784_v28 }
 0x3a1   : > { %v452_v29 = vpop.permute.xlu1 %451  ;;  %v787_v30 = vpop.xlane.xlu0 %786 }
 0x3a2   : > { %455 = vst.msk [vmem:[#allocation3 + $0x8] sm:$0xf] %vm427_vm2, %v452_v29  ;;  %1463 = vrcp.f32 %v787_v30 }
 0x3a5   : > { %v462_v12 = vpop.permute.xlu1 %461  ;;  %v442_v31 = vpop.permute.xlu0 %441 }
 0x3a6   : > { %465 = vst.msk [vmem:[#allocation3 + $0xc] sm:$0xf] %vm427_vm2, %v462_v12  ;;  %445 = vst.msk [vmem:[#allocation3 + $0x4] sm:$0xf] %vm427_vm2, %v442_v31 }
 0x3a7   : > { %v1460_v32 = vpop.eup %1459 }
 0x3a8   : > { %v793_v37 = vmul.f32 %v1460_v32, %v1452_v17 }
 0x3a9   : > { %v552_v33 = vld [vmem:[#allocation3 + $0x8] sm:$0xf] }
 0x3aa   : > { %v897_v34 = vsel %vm803_vm5, %v552_v33, 0  ;;  %v797_v42 = vpack.c.bf16 %v793_v37, %v793_v37 }
 0x3ab   : > { %v1462_v35 = vpop.eup %1461  ;;  %1317 = vmatpush3.bf16.msra.mxu0 %v897_v34 }
 0x3ac   : > { %v794_v36 = vmul.f32 %v1462_v35, %v1454_v19  ;;  %1328 = vmatprep.subr.bf16.mxu0 %v1667_v0 }
 0x3ad   : > { %v551_v38 = vld [vmem:[#allocation3 + $0x4] sm:$0xf]  ;;  %v553_v41 = vld [vmem:[#allocation3 + $0xc] sm:$0xf] }
 0x3ae   : > { %v851_v39 = vsel %vm803_vm5, %v551_v38, 0  ;;  %v798_v40 = vpack.c.bf16 %v794_v36, %v794_v36  ;;  %v943_v44 = vsel %vm803_vm5, %v553_v41, 0 }
 0x3af   : > { %1311 = vmatpush3.bf16.msra.mxu1 %v851_v39  ;;  %v1464_v43 = vpop.eup %1463 }
 0x3b0   : > { %1319 = vmatmul.mubr.msk.bf16.vlgmr.msra.gmra.mxu0 %vm554_vm3, %v798_v40  ;;  %1322 = vmatprep.subr.bf16.mxu1 %v1667_v0  ;;  %v795_v45 = vmul.f32 %v1464_v43, %v1456_v21 }
 0x3b1   : > { %1332 = vmatprep.mubr.msk.bf16.mxu0 %vm1668_vm0, %v1667_v0  ;;  %1329 = vmatpush3.bf16.msra.mxu0 %v1447_v51 }
 0x3b2   : > { %1313 = vmatmul.mubr.msk.bf16.vlgmr.msra.gmra.mxu1 %vm554_vm3, %v797_v42  ;;  %v799_v46 = vpack.c.bf16 %v795_v45, %v795_v45  ;;  %1330 = vmatprep.subr.bf16.mxu0 %v1667_v0 }
 0x3b3   : > { %1323 = vmatpush3.bf16.msra.mxu1 %v943_v44  ;;  %1324 = vmatprep.mubr.msk.bf16.mxu1 %vm1668_vm0, %v1667_v0 }
 0x3b5   : > { %1331 = vmatpush3.bf16.msra.mxu0 %v1448_v52 }
 0x3ba   : > { %1325 = vmatmul.mubr.msk.bf16.vlgmr.msra.gmra.mxu1 %vm554_vm3, %v799_v46 }
 0x404   : > { %v841_v47 = vpop.f32.mrf.mxu0 }
 0x405   : > { %v985_v5 = vpack.c.bf16 %v841_v47, %v841_v47 }
 0x406   : > { %v1308_v48 = vpop.f32.mrf.mxu0 }
 0x408   : > { %v844_v49 = vpop.f32.mrf.mxu0 }
 0x40a   : > { %v1309_v50 = vpop.f32.mrf.mxu0 }
 0x470   : > { %v933_v53 = vpop.f32.mrf.mxu0 }
 0x471   : > { %v987_v54 = vpack.c.bf16 %v933_v53, %v933_v53 }
 0x472   : > { %v887_v55 = vpop.f32.mrf.mxu1  ;;  %v1320_v56 = vpop.f32.mrf.mxu0 }
 0x473   : > { %v986_v57 = vpack.c.bf16 %v887_v55, %v887_v55  ;;  %993 = vrot.lane.b32.xlu1 %v987_v54, %s1676_s22  ;;  %s1577_s22 = scalar_lea.vmem %s1576_s18, 256 }
 0x474   : > { %v1314_v58 = vpop.f32.mrf.mxu1  ;;  %v936_v59 = vpop.f32.mrf.mxu0  ;;  %p1579_p6 = scmp.lt.s32.totalorder %s1577_s22, %s1571_s27 }
 0x475   : > { %990 = vrot.lane.b32.xlu0 %v986_v57, %s1677_s20 }
 0x476   : > { %v890_v60 = vpop.f32.mrf.mxu1  ;;  %v1321_v61 = vpop.f32.mrf.mxu0  ;;  %p1580_p9 = por %p1579_p6, %p1578_p7 }
 0x478   : > { %v1315_v62 = vpop.f32.mrf.mxu1  ;;  %p1581_p13 = pnand %p1580_p9, %p1574_p11 }
 0x47a   : > { %v979_v63 = vpop.f32.mrf.mxu1 }
 0x47b   : > { %v988_v1 = vpack.c.bf16 %v979_v63, %v979_v63 }
 0x47c   : > { %v1326_v2 = vpop.f32.mrf.mxu1 }
 0x47d   : > { %996 = vrot.lane.b32.xlu0 %v988_v1, %s1678_s19 }
 0x47e   : > { %v982_v0 = vpop.f32.mrf.mxu1 }
 0x480   : > { %v1327_v3 = vpop.f32.mrf.mxu1 }
 0x4e5   : > { %v994_v7 = vpop.permute.xlu1 %993 }
 0x4e7   : > { %v991_v4 = vpop.permute.xlu0 %990 }
 0x4e8   : > { %v1000_v6 = vsel %vm554_vm3, %v985_v5, %v991_v4 }
 0x4e9   : > { %v1003_v9 = vsel %vm1001_vm6, %v1000_v6, %v994_v7 }
 0x4ef   : > { %v997_v8 = vpop.permute.xlu0 %996 }
 0x4f0   : > { %v1006_v10 = vsel %vm1004_vm7, %v1003_v9, %v997_v8 }
 0x4f1   : > { %1333 = vmatmul.mubr.msk.bf16.vlgmr.msra.gmra.mxu0 %vm382_vm1, %v1006_v10 }
 0x5b1   : > { %v1066_v13 = vpop.f32.mrf.mxu0 }
 0x5b2   : > { %v1067_v14 = vadd.f32 %v1230_v11, %v1066_v13 }
 0x5b3   : > { %v1334_v15 = vpop.f32.mrf.mxu0 }
 0x5b4   : > { %1072 = vst.msk [vmem:[%s351_s9] sm:$0xff] %vm382_vm1, %v1067_v14 }
 0x5b5   : > { %v1069_v16 = vpop.f32.mrf.mxu0 }
 0x5b6   : > { %1584 = shalt.err (!%p1581_p13)
}
 0x5b7   : > { %s1585_s20 = scalar_lea.hbm %s1966_s21, 128  ;;  %s1589_s15 = scalar_lea.hbm %s2022_s7, 256 }
 0x5b8   : > { %p1586_p1 = scmp.ne.s32.totalorder %s1966_s21, %s1585_s20  ;;  %p1590_p12 = scmp.lt.s32.totalorder %s1966_s21, %s2022_s7 }
 0x5b9   : > { %p1591_p5 = scmp.lt.s32.totalorder %s1589_s15, %s1585_s20 }
 0x5ba   : > { %p1587_p4 = pnand %p1586_p1, %p1820_p0 }
 0x5bb   : > { %p1592_p3 = por %p1591_p5, %p1590_p12 }
 0x5bc   : > { %p1588_p8 = pneg %p1587_p4 }
 0x5be   : > { %p1593_p10 = pnand %p1592_p3, %p1588_p8 }
 0x5c0   : > { %1596 = shalt.err (!%p1593_p10)
}
 0x5c1   : > { %1350 = dma.vmem_to_hbm [thread:$0]  (%p1820_p0), %s1968_s11, 128, %s1966_s21, %s1074_s30   ;;  %v1335_v17 = vpop.f32.mrf.mxu0 }
 0x5c2 PF: > { %s1100_s5 = sand.u32 1, %s1639_s24   ;;  %p2044_p2 = scmp.ne.s32.totalorder %s2033_s12, 0 }
 0x5c3   : > { %p2045_p11 = scmp.ge.s32.totalorder %s1659_s29, 2  ;;  %s1101_s9 = scalar_lea.sflag [#allocation6], %s1100_s5 }
 0x5c5   : > { %p1367_p7 = pnand %p2045_p11, %p2044_p2 }
 0x5c7   : > { %p1368_p6 = pneg %p1367_p7 }
 0x5c9   : > { %1634 = dma.done.wait (%p1368_p6), %s1101_s9, 128  }
 0x5ca   : > { %1636 = vsyncadd (%p1368_p6), %s1101_s9, 4294967168  ;;  %s25_s29 = sadd.s32 1, %s1659_s29   ;;  %s2046_s24 = smov %s1643_s25 }
 0x5cb   : > { %p22_p9 = scmp.ge.s32.totalorder %s25_s29, 4   ;;  %s2047_s25 = smov %s1647_s26 }
 0x5cc   : > { %s2048_s26 = smov %s1832_s23  ;;  %s2049_s27 = smov %s1655_s28 }
 0x5cd   : > { %s2050_s28 = smov %s2052_s8  ;;  %24 = sbr.rel (!%p22_p9) target bundleno = 12 (0xc), region = 116 }
 0x5d2   :  { %1106 = vsyncpa [#allocation5], 1 }
 0x5d3   :  { %1108 = vsyncpa [#allocation5 + $0x1], 1 }
 0x5d4   :  { %1109 = vsyncpa [#allocation8], 1 }
 0x5d5   :  { %1110 = vsyncpa [#allocation11], 1 }
 0x5d6   :  { %1111 = vsyncpa [#allocation6], 1 }
 0x5d7   :  { %1113 = vsyncpa [#allocation6 + $0x1], 1 }

</bundles_post_ra>
